<compile_context>
chip_gen: v6e
topology: v6e:2x2x1
jax: 0.10.0
libtpu: 0.0.40
codegen_flags: <defaults>
</compile_context>

<pallas_src>
import functools

import jax
import jax.numpy as jnp
from jax.experimental import pallas as pl
from jax.experimental.pallas import tpu as pltpu

VOC_CLASSES = 21


def _round_up(x, m):
    return (x + m - 1) // m * m


# ----------------------------------------------------------------------------
# Fused kernel: [space-to-depth'd 5x5/s2 conv as 3x3/s1]  ->  mask (= zero-pad hp)
#               ->  [ConvTranspose 5x5/s2 as one 3x3/s1 conv with 4 fused phases]
# One grid step = one batch element x one TH-row tile of the phase map y4.
# ----------------------------------------------------------------------------
def _fcn_fused_kernel(xa_ref, xh_ref, w1_ref, b1_ref, wT_ref, bT_ref, o_ref, *,
                      th, oh1, ow1, ow4p):
    cin = xa_ref.shape[-1]            # 12  (space-to-depth of 3 input channels)
    co1 = w1_ref.shape[-1]            # 32  (conv1 output channels)
    hpw = ow4p + 8                    # conv1/hp width computed in-kernel (mult of 8)

    # TH-row input slab + 4-row halo (two BlockSpecs over the same array).
    rows = jnp.concatenate([xa_ref[0], xh_ref[0]], axis=0)        # (TH+4, Wsp, 12) bf16

    # ---- conv1: in-VMEM im2col (9 shifted windows, lane concat) + one MXU matmul ----
    win = []
    for kh in range(3):
        for kw in range(3):                                       # static taps
            win.append(rows[kh:kh + th + 2, kw:kw + hpw, :])      # (TH+2, HPW, 12)
    a1 = jnp.concatenate(win, axis=-1).reshape((th + 2) * hpw, 9 * cin)
    h = jnp.dot(a1, w1_ref[...], preferred_element_type=jnp.float32)    # f32 accum
    h = (h + b1_ref[...]).reshape(th + 2, hpw, co1)

    # ---- build the zero-padded ConvTranspose input (hp) purely by masking ----------
    # hp row j  == h row (r0 + j - 2)   valid iff 0 <= r0 + j - 2 < OH1, else 0
    # hp col m  == h col (m - 2)        valid iff 2 <= m < 2 + OW1,       else 0
    r0 = pl.program_id(1) * th
    ridx = jax.lax.broadcasted_iota(jnp.int32, (th + 2, 1, 1), 0) + (r0 - 2)
    cidx = jax.lax.broadcasted_iota(jnp.int32, (1, hpw, 1), 1)
    valid = (ridx >= 0) & (ridx < oh1) & (cidx >= 2) & (cidx < 2 + ow1)
    hp = jnp.where(valid, h, 0.0).astype(jnp.bfloat16)            # (TH+2, HPW, 32)

    # ---- convT: 4 sub-pixel phases fused as one 3x3 conv, Cout = 4*21 -> 128 pad ----
    win2 = []
    for kh in range(3):
        for kw in range(3):
            win2.append(hp[kh:kh + th, kw:kw + ow4p, :])          # (TH, OW4p, 32)
    a2 = jnp.concatenate(win2, axis=-1).reshape(th * ow4p, 9 * co1)
    acc = jnp.dot(a2, wT_ref[...], preferred_element_type=jnp.float32)  # f32 accum
    acc = acc + bT_ref[...]                                       # bias once, f32 epilogue
    o_ref[0] = acc.reshape(th, ow4p, -1).astype(o_ref.dtype)      # lane-dense bf16 store


# ----------------------------------------------------------------------------
# Glue (cheap XLA layout transforms only — no FLOPs, no data duplication)
# ----------------------------------------------------------------------------
def _space_to_depth2(x_nhwc):
    N, H, W, C = x_nhwc.shape
    Hp, Wp = _round_up(H, 2), _round_up(W, 2)
    if (Hp, Wp) != (H, W):
        x_nhwc = jnp.pad(x_nhwc, ((0, 0), (0, Hp - H), (0, Wp - W), (0, 0)))
    x = x_nhwc.reshape(N, Hp // 2, 2, Wp // 2, 2, C)
    x = x.transpose(0, 1, 3, 2, 4, 5).reshape(N, Hp // 2, Wp // 2, 4 * C)
    return x


def _prep_conv1_weight(w_oihw):
    """Conv2d(3,32,5,s=2) weight -> space-to-depth 3x3 stride-1 weight (3,3,12,32)."""
    Cout, Cin, KH, KW = w_oihw.shape                                  # (32, 3, 5, 5)
    w = jnp.transpose(w_oihw, (2, 3, 1, 0))                           # HWIO (5,5,3,32)
    w = jnp.pad(w, ((0, 1), (0, 1), (0, 0), (0, 0)))                  # (6,6,3,32), tap 5 = 0
    w = w.reshape(3, 2, 3, 2, Cin, Cout).transpose(0, 2, 1, 3, 4, 5)  # (a,b,di,dj,c,o)
    return w.reshape(3, 3, 4 * Cin, Cout)                             # s2d channel order (di,dj,c)


def _prep_convT_weight(w_pt):
    """ConvTranspose2d(32,21,5,s=2) weight -> 4 fused 3x3 phase kernels (3,3,32,84)."""
    Cin, Cout, KH, KW = w_pt.shape                                    # (32, 21, 5, 5)
    wz = jnp.pad(w_pt, ((0, 0), (0, 0), (1, 0), (1, 0)))              # index 0 == zero tap
    idx_even = jnp.array([5, 3, 1])                                   # taps w4, w2, w0
    idx_odd = jnp.array([0, 4, 2])                                    # taps 0,  w3, w1
    phase_ws = []
    for p_idx in (idx_even, idx_odd):                                 # row phase (major)
        for q_idx in (idx_even, idx_odd):                             # col phase (minor)
            wk = wz[:, :, p_idx][:, :, :, q_idx]                      # (Cin, Cout, 3, 3)
            phase_ws.append(jnp.transpose(wk, (2, 3, 0, 1)))          # (3, 3, Cin, Cout)
    return jnp.concatenate(phase_ws, axis=-1)                         # (3, 3, 32, 84)


# ----------------------------------------------------------------------------
# FCN forward (NCHW in, NCHW out — PyTorch semantics)
# ----------------------------------------------------------------------------
def fcn_forward(x_nchw, params, *, row_tile=16):
    # TODO(synk): original forward() returns the constant 0 and ConvTranspose2d() has
    # no arguments; we implement the implied Conv2d(3,32,5,s2) -> ConvTranspose2d(32,21,5,s2).
    N = x_nchw.shape[0]
    x = jnp.transpose(x_nchw, (0, 2, 3, 1)).astype(jnp.bfloat16)      # NCHW -> NHWC bf16
    xs = _space_to_depth2(x)                                          # (N, Hs, Ws, 12)
    _, Hs, Ws, C4 = xs.shape

    OH1, OW1 = Hs - 2, Ws - 2                                         # conv1 output size
    OH4, OW4 = OH1 + 2, OW1 + 2                                       # phase-map (y4) size
    OW4p = _round_up(OW4, 8)                                          # sublane-aligned cols
    HPW = OW4p + 8                                                    # in-kernel conv1 width
    Wsp = HPW + 2                                                     # xsp width the kernel reads

    assert row_tile % 4 == 0 and row_tile >= 4
    TH = min(row_tile, _round_up(OH4, 4))
    n_tiles = pl.cdiv(OH4, TH)
    R = n_tiles * TH + 4                                              # rows incl. 4-row halo

    # Single HBM prep: 2 zero rows on top / 2 zero cols on the left (the hp halo),
    # zeros to the bottom/right so every (TH + 4-halo)-row block read is in bounds.
    xsp = jnp.pad(xs, ((0, 0), (2, R - 2 - Hs), (2, Wsp - 2 - Ws), (0, 0)))

    C1 = params["w1"].shape[-1]                                       # 32
    CT = params["wT"].shape[-1]                                       # 84 = 4 * 21
    CTp = _round_up(CT, 128)                                          # 128: lane-dense stores
    w1 = params["w1"].reshape(9 * C4, C1).astype(jnp.bfloat16)        # (108, 32)
    b1 = params["b1"].astype(jnp.float32).reshape(1, C1)
    wT = jnp.pad(params["wT"].reshape(9 * C1, CT),
                 ((0, 0), (0, CTp - CT))).astype(jnp.bfloat16)        # (288, 128)
    bT = jnp.pad(params["bT"].astype(jnp.float32), (0, CTp - CT)).reshape(1, CTp)

    kernel = functools.partial(_fcn_fused_kernel, th=TH, oh1=OH1, ow1=OW1, ow4p=OW4p)

    flops = 2 * N * n_tiles * ((TH + 2) * HPW * (9 * C4) * C1 + TH * OW4p * (9 * C1) * CTp)
    bytes_accessed = int(xsp.size * 2 * (TH + 4) / TH + w1.size * 2 + wT.size * 2
                         + b1.size * 4 + bT.size * 4 + N * OH4 * OW4p * CTp * 2)
    cost = pl.CostEstimate(flops=flops, transcendentals=0, bytes_accessed=bytes_accessed)

    y4 = pl.pallas_call(
        kernel,
        out_shape=jax.ShapeDtypeStruct((N, OH4, OW4p, CTp), jnp.bfloat16),
        grid=(N, n_tiles),
        in_specs=[
            # TH-row main input slab ...
            pl.BlockSpec((1, TH, Wsp, C4), lambda n, i: (n, i, 0, 0)),
            # ... plus a dedicated 4-row halo block (same array, shifted index map).
            pl.BlockSpec((1, 4, Wsp, C4), lambda n, i: (n, (i + 1) * (TH // 4), 0, 0)),
            pl.BlockSpec((9 * C4, C1), lambda n, i: (0, 0)),          # resident conv1 weight
            pl.BlockSpec((1, C1), lambda n, i: (0, 0)),               # resident conv1 bias
            pl.BlockSpec((9 * C1, CTp), lambda n, i: (0, 0)),         # resident convT weight
            pl.BlockSpec((1, CTp), lambda n, i: (0, 0)),              # resident convT bias
        ],
        out_specs=pl.BlockSpec((1, TH, OW4p, CTp), lambda n, i: (n, i, 0, 0)),
        compiler_params=pltpu.CompilerParams(
            dimension_semantics=("parallel", "parallel"),             # megacore-shardable
            vmem_limit_bytes=48 * 1024 * 1024,                        # v7x-safe (64 MiB/TC)
        ),
        cost_estimate=cost,
    )(xsp, xsp, w1, b1, wT, bT)

    # Epilogue (pure layout): crop column/channel padding, upcast, interleave the 4
    # sub-pixel phases with a single reshape/transpose (no strided scatters), crop, NCHW.
    y4 = y4[:, :, :OW4, :CT].astype(jnp.float32)                      # (N, OH4, OW4, 84)
    y = y4.reshape(N, OH4, OW4, 2, 2, VOC_CLASSES)                    # (.., p, q, class)
    y = y.transpose(0, 1, 3, 2, 4, 5).reshape(N, 2 * OH4, 2 * OW4, VOC_CLASSES)
    OHt, OWt = 2 * OH1 + 3, 2 * OW1 + 3
    return jnp.transpose(y[:, :OHt, :OWt, :], (0, 3, 1, 2))           # NHWC -> NCHW


def init_params(key):
    k1, k2, k3, k4 = jax.random.split(key, 4)
    w1_oihw = jax.random.normal(k1, (32, 3, 5, 5), jnp.float32) * 0.05
    b1 = jax.random.normal(k2, (32,), jnp.float32) * 0.01
    wt_pt = jax.random.normal(k3, (32, VOC_CLASSES, 5, 5), jnp.float32) * 0.05
    bt = jax.random.normal(k4, (VOC_CLASSES,), jnp.float32) * 0.01
    raw = {"w1_oihw": w1_oihw, "b1": b1, "wt_pt": wt_pt, "bt": bt}
    prepped = {
        "w1": _prep_conv1_weight(w1_oihw),     # (3, 3, 12, 32)
        "b1": b1,
        "wT": _prep_convT_weight(wt_pt),       # (3, 3, 32, 84)
        "bT": jnp.tile(bt, 4),                 # (84,)  phase-replicated bias
    }
    return raw, prepped


def _reference_forward(x_nchw, raw):
    """Pure-XLA reference (lax convolutions), matched to the kernel's bf16-input /
    f32-accumulate numerics (inputs/weights/intermediate/output rounded to bf16)."""
    q = lambda t: t.astype(jnp.bfloat16).astype(jnp.float32)
    dn = ("NHWC", "HWIO", "NHWC")
    x = q(jnp.transpose(x_nchw, (0, 2, 3, 1)))
    w1 = q(jnp.transpose(raw["w1_oihw"], (2, 3, 1, 0)))
    h = jax.lax.conv_general_dilated(x, w1, (2, 2), "VALID", dimension_numbers=dn)
    h = q(h + raw["b1"].reshape(1, 1, 1, -1))
    wt = q(jnp.transpose(jnp.flip(raw["wt_pt"], axis=(2, 3)), (2, 3, 0, 1)))
    K = wt.shape[0]
    y = jax.lax.conv_general_dilated(
        h, wt, (1, 1), [(K - 1, K - 1), (K - 1, K - 1)],
        lhs_dilation=(2, 2), dimension_numbers=dn)
    y = q(y + raw["bt"].reshape(1, 1, 1, -1))
    return jnp.transpose(y, (0, 3, 1, 2))


if __name__ == "__main__":
    key = jax.random.PRNGKey(0)
    k_param, k_x, k_x2 = jax.random.split(key, 3)
    raw_params, params = init_params(k_param)

    fwd = jax.jit(fcn_forward)

    # Even, square input (NCHW).
    x = jax.random.normal(k_x, (2, 3, 16, 16), jnp.float32)
    out = jax.block_until_ready(fwd(x, params))
    assert out.shape == (2, VOC_CLASSES, 15, 15), out.shape
    ref = jax.block_until_ready(_reference_forward(x, raw_params))
    max_err = float(jnp.max(jnp.abs(out - ref)))
    assert jnp.allclose(out, ref, atol=2e-2, rtol=2e-2), max_err

    # Odd, non-square input: exercises the space-to-depth pad and phase-crop edge paths.
    x2 = jax.random.normal(k_x2, (1, 3, 17, 13), jnp.float32)
    out2 = jax.block_until_ready(fwd(x2, params))
    assert out2.shape == (1, VOC_CLASSES, 17, 13), out2.shape
    ref2 = jax.block_until_ready(_reference_forward(x2, raw_params))
    max_err2 = float(jnp.max(jnp.abs(out2 - ref2)))
    assert jnp.allclose(out2, ref2, atol=2e-2, rtol=2e-2), max_err2

    print("KERNEL_OK")
</pallas_src>

<mosaic_0001>
module attributes {stable_mosaic.version = 11 : i64} {
  func.func @_fcn_fused_kernel(%arg0: i32, %arg1: i32, %arg2: memref<1x8x18x12xbf16, #tpu.memory_space<vmem>>, %arg3: memref<1x4x18x12xbf16, #tpu.memory_space<vmem>>, %arg4: memref<108x32xbf16, #tpu.memory_space<vmem>>, %arg5: memref<1x32xf32, #tpu.memory_space<vmem>>, %arg6: memref<288x128xbf16, #tpu.memory_space<vmem>>, %arg7: memref<1x128xf32, #tpu.memory_space<vmem>>, %arg8: memref<1x8x8x128xbf16, #tpu.memory_space<vmem>>) attributes {dimension_semantics = [#tpu.dimension_semantics<parallel>, #tpu.dimension_semantics<parallel>], iteration_bounds = array<i64: 2, 1>, scalar_prefetch = 0 : i64, scratch_operands = 0 : i64, tpu.core_type = #tpu.core_type<tc>, window_params = [{transform_indices = @transform_0, window_bounds = array<i64: 1, 8, 18, 12>}, {transform_indices = @transform_1, window_bounds = array<i64: 1, 4, 18, 12>}, {pipeline_mode = #tpu.pipeline_mode<synchronous>, transform_indices = @transform_2, window_bounds = array<i64: 108, 32>}, {pipeline_mode = #tpu.pipeline_mode<synchronous>, transform_indices = @transform_3, window_bounds = array<i64: 1, 32>}, {pipeline_mode = #tpu.pipeline_mode<synchronous>, transform_indices = @transform_4, window_bounds = array<i64: 288, 128>}, {pipeline_mode = #tpu.pipeline_mode<synchronous>, transform_indices = @transform_5, window_bounds = array<i64: 1, 128>}, {transform_indices = @transform_6, window_bounds = array<i64: 1, 8, 8, 128>}]} {
    %c0 = arith.constant 0 : index
    %c0_0 = arith.constant 0 : index
    %c0_1 = arith.constant 0 : index
    %c0_2 = arith.constant 0 : index
    %0 = vector.load %arg2[%c0, %c0_0, %c0_1, %c0_2] : memref<1x8x18x12xbf16, #tpu.memory_space<vmem>>, vector<1x8x18x12xbf16>
    %1 = vector.shape_cast %0 : vector<1x8x18x12xbf16> to vector<8x18x12xbf16>
    %c0_3 = arith.constant 0 : index
    %c0_4 = arith.constant 0 : index
    %c0_5 = arith.constant 0 : index
    %c0_6 = arith.constant 0 : index
    %2 = vector.load %arg3[%c0_3, %c0_4, %c0_5, %c0_6] : memref<1x4x18x12xbf16, #tpu.memory_space<vmem>>, vector<1x4x18x12xbf16>
    %3 = vector.shape_cast %2 : vector<1x4x18x12xbf16> to vector<4x18x12xbf16>
    %4 = tpu.concatenate %1, %3 in 0 : vector<8x18x12xbf16>, vector<4x18x12xbf16> -> vector<12x18x12xbf16>
    %5 = vector.extract_strided_slice %4 {offsets = [0, 0, 0], sizes = [10, 16, 12], strides = [1, 1, 1]} : vector<12x18x12xbf16> to vector<10x16x12xbf16>
    %6 = vector.extract_strided_slice %4 {offsets = [0, 1, 0], sizes = [10, 16, 12], strides = [1, 1, 1]} : vector<12x18x12xbf16> to vector<10x16x12xbf16>
    %7 = vector.extract_strided_slice %4 {offsets = [0, 2, 0], sizes = [10, 16, 12], strides = [1, 1, 1]} : vector<12x18x12xbf16> to vector<10x16x12xbf16>
    %8 = vector.extract_strided_slice %4 {offsets = [1, 0, 0], sizes = [10, 16, 12], strides = [1, 1, 1]} : vector<12x18x12xbf16> to vector<10x16x12xbf16>
    %9 = vector.extract_strided_slice %4 {offsets = [1, 1, 0], sizes = [10, 16, 12], strides = [1, 1, 1]} : vector<12x18x12xbf16> to vector<10x16x12xbf16>
    %10 = vector.extract_strided_slice %4 {offsets = [1, 2, 0], sizes = [10, 16, 12], strides = [1, 1, 1]} : vector<12x18x12xbf16> to vector<10x16x12xbf16>
    %11 = vector.extract_strided_slice %4 {offsets = [2, 0, 0], sizes = [10, 16, 12], strides = [1, 1, 1]} : vector<12x18x12xbf16> to vector<10x16x12xbf16>
    %12 = vector.extract_strided_slice %4 {offsets = [2, 1, 0], sizes = [10, 16, 12], strides = [1, 1, 1]} : vector<12x18x12xbf16> to vector<10x16x12xbf16>
    %13 = vector.extract_strided_slice %4 {offsets = [2, 2, 0], sizes = [10, 16, 12], strides = [1, 1, 1]} : vector<12x18x12xbf16> to vector<10x16x12xbf16>
    %14 = tpu.concatenate %5, %6, %7, %8, %9, %10, %11, %12, %13 in 2 : vector<10x16x12xbf16>, vector<10x16x12xbf16>, vector<10x16x12xbf16>, vector<10x16x12xbf16>, vector<10x16x12xbf16>, vector<10x16x12xbf16>, vector<10x16x12xbf16>, vector<10x16x12xbf16>, vector<10x16x12xbf16> -> vector<10x16x108xbf16>
    %15 = vector.shape_cast %14 : vector<10x16x108xbf16> to vector<160x108xbf16>
    %c0_7 = arith.constant 0 : index
    %c0_8 = arith.constant 0 : index
    %16 = vector.load %arg4[%c0_7, %c0_8] : memref<108x32xbf16, #tpu.memory_space<vmem>>, vector<108x32xbf16>
    %cst = arith.constant dense<0.000000e+00> : vector<160x32xf32>
    %17 = tpu.matmul %15, %16, %cst {dimension_numbers = #tpu.dot_dimension_numbers<[1], [0], [0], [1], [0, 0, 1, 1], [], []>} : vector<160x108xbf16>, vector<108x32xbf16>, vector<160x32xf32> -> vector<160x32xf32>
    %c0_9 = arith.constant 0 : index
    %c0_10 = arith.constant 0 : index
    %18 = vector.load %arg5[%c0_9, %c0_10] : memref<1x32xf32, #tpu.memory_space<vmem>>, vector<1x32xf32>
    %19 = vector.broadcast %18 : vector<1x32xf32> to vector<160x32xf32>
    %20 = arith.addf %17, %19 : vector<160x32xf32>
    %21 = vector.shape_cast %20 : vector<160x32xf32> to vector<10x16x32xf32>
    %c8_i32 = arith.constant 8 : i32
    %22 = arith.muli %arg1, %c8_i32 : i32
    %23 = tpu.iota {dimensions = array<i32: 0>} : vector<10x1x1xi32>
    %c2_i32 = arith.constant 2 : i32
    %24 = arith.subi %22, %c2_i32 : i32
    %25 = vector.broadcast %24 : i32 to vector<10x1x1xi32>
    %26 = arith.addi %23, %25 : vector<10x1x1xi32>
    %27 = tpu.iota {dimensions = array<i32: 1>} : vector<1x16x1xi32>
    %c0_i32 = arith.constant 0 : i32
    %28 = vector.broadcast %c0_i32 : i32 to vector<10x1x1xi32>
    %29 = arith.cmpi sge, %26, %28 : vector<10x1x1xi32>
    %c6_i32 = arith.constant 6 : i32
    %30 = vector.broadcast %c6_i32 : i32 to vector<10x1x1xi32>
    %31 = arith.cmpi slt, %26, %30 : vector<10x1x1xi32>
    %32 = arith.andi %29, %31 : vector<10x1x1xi1>
    %c2_i32_11 = arith.constant 2 : i32
    %33 = vector.broadcast %c2_i32_11 : i32 to vector<1x16x1xi32>
    %34 = arith.cmpi sge, %27, %33 : vector<1x16x1xi32>
    %35 = vector.broadcast %32 : vector<10x1x1xi1> to vector<10x16x1xi1>
    %36 = vector.broadcast %34 : vector<1x16x1xi1> to vector<10x16x1xi1>
    %37 = arith.andi %35, %36 : vector<10x16x1xi1>
    %c8_i32_12 = arith.constant 8 : i32
    %38 = vector.broadcast %c8_i32_12 : i32 to vector<1x16x1xi32>
    %39 = arith.cmpi slt, %27, %38 : vector<1x16x1xi32>
    %40 = vector.broadcast %39 : vector<1x16x1xi1> to vector<10x16x1xi1>
    %41 = arith.andi %37, %40 : vector<10x16x1xi1>
    %cst_13 = arith.constant 0.000000e+00 : f32
    %42 = vector.shape_cast %41 : vector<10x16x1xi1> to vector<10x16x1xi1>
    %43 = vector.broadcast %42 : vector<10x16x1xi1> to vector<10x16x32xi1>
    %44 = vector.broadcast %cst_13 : f32 to vector<10x16x32xf32>
    %45 = arith.select %43, %21, %44 : vector<10x16x32xi1>, vector<10x16x32xf32>
    %46 = arith.truncf %45 : vector<10x16x32xf32> to vector<10x16x32xbf16>
    %47 = vector.extract_strided_slice %46 {offsets = [0, 0, 0], sizes = [8, 8, 32], strides = [1, 1, 1]} : vector<10x16x32xbf16> to vector<8x8x32xbf16>
    %48 = vector.extract_strided_slice %46 {offsets = [0, 1, 0], sizes = [8, 8, 32], strides = [1, 1, 1]} : vector<10x16x32xbf16> to vector<8x8x32xbf16>
    %49 = vector.extract_strided_slice %46 {offsets = [0, 2, 0], sizes = [8, 8, 32], strides = [1, 1, 1]} : vector<10x16x32xbf16> to vector<8x8x32xbf16>
    %50 = vector.extract_strided_slice %46 {offsets = [1, 0, 0], sizes = [8, 8, 32], strides = [1, 1, 1]} : vector<10x16x32xbf16> to vector<8x8x32xbf16>
    %51 = vector.extract_strided_slice %46 {offsets = [1, 1, 0], sizes = [8, 8, 32], strides = [1, 1, 1]} : vector<10x16x32xbf16> to vector<8x8x32xbf16>
    %52 = vector.extract_strided_slice %46 {offsets = [1, 2, 0], sizes = [8, 8, 32], strides = [1, 1, 1]} : vector<10x16x32xbf16> to vector<8x8x32xbf16>
    %53 = vector.extract_strided_slice %46 {offsets = [2, 0, 0], sizes = [8, 8, 32], strides = [1, 1, 1]} : vector<10x16x32xbf16> to vector<8x8x32xbf16>
    %54 = vector.extract_strided_slice %46 {offsets = [2, 1, 0], sizes = [8, 8, 32], strides = [1, 1, 1]} : vector<10x16x32xbf16> to vector<8x8x32xbf16>
    %55 = vector.extract_strided_slice %46 {offsets = [2, 2, 0], sizes = [8, 8, 32], strides = [1, 1, 1]} : vector<10x16x32xbf16> to vector<8x8x32xbf16>
    %56 = tpu.concatenate %47, %48, %49, %50, %51, %52, %53, %54, %55 in 2 : vector<8x8x32xbf16>, vector<8x8x32xbf16>, vector<8x8x32xbf16>, vector<8x8x32xbf16>, vector<8x8x32xbf16>, vector<8x8x32xbf16>, vector<8x8x32xbf16>, vector<8x8x32xbf16>, vector<8x8x32xbf16> -> vector<8x8x288xbf16>
    %57 = vector.shape_cast %56 : vector<8x8x288xbf16> to vector<64x288xbf16>
    %c0_14 = arith.constant 0 : index
    %c0_15 = arith.constant 0 : index
    %58 = vector.load %arg6[%c0_14, %c0_15] : memref<288x128xbf16, #tpu.memory_space<vmem>>, vector<288x128xbf16>
    %cst_16 = arith.constant dense<0.000000e+00> : vector<64x128xf32>
    %59 = tpu.matmul %57, %58, %cst_16 {dimension_numbers = #tpu.dot_dimension_numbers<[1], [0], [0], [1], [0, 0, 1, 1], [], []>} : vector<64x288xbf16>, vector<288x128xbf16>, vector<64x128xf32> -> vector<64x128xf32>
    %c0_17 = arith.constant 0 : index
    %c0_18 = arith.constant 0 : index
    %60 = vector.load %arg7[%c0_17, %c0_18] : memref<1x128xf32, #tpu.memory_space<vmem>>, vector<1x128xf32>
    %61 = vector.broadcast %60 : vector<1x128xf32> to vector<64x128xf32>
    %62 = arith.addf %59, %61 : vector<64x128xf32>
    %63 = vector.shape_cast %62 : vector<64x128xf32> to vector<8x8x128xf32>
    %64 = arith.truncf %63 : vector<8x8x128xf32> to vector<8x8x128xbf16>
    %c0_19 = arith.constant 0 : index
    %c0_20 = arith.constant 0 : index
    %c0_21 = arith.constant 0 : index
    %c0_22 = arith.constant 0 : index
    %65 = vector.load %arg8[%c0_19, %c0_20, %c0_21, %c0_22] : memref<1x8x8x128xbf16, #tpu.memory_space<vmem>>, vector<1x8x8x128xbf16>
    %66 = vector.shape_cast %65 : vector<1x8x8x128xbf16> to vector<8x8x128xbf16>
    %67 = vector.shape_cast %64 : vector<8x8x128xbf16> to vector<1x8x8x128xbf16>
    tpu.vector_store %arg8[%c0_19, %c0_20, %c0_21, %c0_22], %67 {strides = array<i32>} : memref<1x8x8x128xbf16, #tpu.memory_space<vmem>>, vector<1x8x8x128xbf16>,
    return
  }
  func.func @transform_0(%arg0: i32, %arg1: i32) -> (i32, i32, i32, i32) {
    %c0_i32 = arith.constant 0 : i32
    %c0_i32_0 = arith.constant 0 : i32
    %c0_i32_1 = arith.constant 0 : i32
    return %arg0, %arg1, %c0_i32, %c0_i32_0 : i32, i32, i32, i32
  }
  func.func @transform_1(%arg0: i32, %arg1: i32) -> (i32, i32, i32, i32) {
    %c1_i32 = arith.constant 1 : i32
    %0 = arith.addi %arg1, %c1_i32 : i32
    %c2_i32 = arith.constant 2 : i32
    %1 = arith.muli %0, %c2_i32 : i32
    %c0_i32 = arith.constant 0 : i32
    %c0_i32_0 = arith.constant 0 : i32
    %c0_i32_1 = arith.constant 0 : i32
    return %arg0, %1, %c0_i32, %c0_i32_0 : i32, i32, i32, i32
  }
  func.func @transform_2(%arg0: i32, %arg1: i32) -> (i32, i32) {
    %c0_i32 = arith.constant 0 : i32
    %c0_i32_0 = arith.constant 0 : i32
    %c0_i32_1 = arith.constant 0 : i32
    return %c0_i32, %c0_i32_0 : i32, i32
  }
  func.func @transform_3(%arg0: i32, %arg1: i32) -> (i32, i32) {
    %c0_i32 = arith.constant 0 : i32
    %c0_i32_0 = arith.constant 0 : i32
    %c0_i32_1 = arith.constant 0 : i32
    return %c0_i32, %c0_i32_0 : i32, i32
  }
  func.func @transform_4(%arg0: i32, %arg1: i32) -> (i32, i32) {
    %c0_i32 = arith.constant 0 : i32
    %c0_i32_0 = arith.constant 0 : i32
    %c0_i32_1 = arith.constant 0 : i32
    return %c0_i32, %c0_i32_0 : i32, i32
  }
  func.func @transform_5(%arg0: i32, %arg1: i32) -> (i32, i32) {
    %c0_i32 = arith.constant 0 : i32
    %c0_i32_0 = arith.constant 0 : i32
    %c0_i32_1 = arith.constant 0 : i32
    return %c0_i32, %c0_i32_0 : i32, i32
  }
  func.func @transform_6(%arg0: i32, %arg1: i32) -> (i32, i32, i32, i32) {
    %c0_i32 = arith.constant 0 : i32
    %c0_i32_0 = arith.constant 0 : i32
    %c0_i32_1 = arith.constant 0 : i32
    return %arg0, %arg1, %c0_i32, %c0_i32_0 : i32, i32, i32, i32
  }
}

</mosaic_0001>

<bundles_post_ra>
// kernel: fcn_forward.1
= control target key start
LH: loop header
LB: loop body
LE: loop exit
PB: predicated region body
PF: predicated region fallthrough
CT: control target
= control target key end

     0   :  { %s2573_s21 = smov 0   ;;  %s2575_s22 = smov 0   ;;  %s3333_s0 = inlined_call_operand.vmem [shape: bf16[2,12,18,12], index: 0, kind: input, shape index: {}, may-alias: {0,1}]   ;;  %s3334_s1 = inlined_call_operand.vmem [shape: bf16[2,12,18,12], index: 1, kind: input, shape index: {}, may-alias: {0,1}]   ;;  %s3335_s2 = inlined_call_operand.vmem [shape: bf16[108,32], index: 2, kind: input, shape index: {}]   ;;  %s3336_s3 = inlined_call_operand.vmem [shape: f32[1,32], index: 3, kind: input, shape index: {}]   ;;  %s3337_s4 = inlined_call_operand.vmem [shape: bf16[288,128], index: 4, kind: input, shape index: {}]   ;;  %s3338_s5 = inlined_call_operand.vmem [shape: f32[1,128], index: 5, kind: input, shape index: {}]   ;;  %s3339_s6 = inlined_call_operand.vmem [shape: bf16[2,8,8,128], index: 6, kind: output, shape index: {}]  }
   0x1   :  { %s2577_s23 = smov 0  }
   0x2 LB: > { %s28_s24 = sadd.s32 1, %s2519_s22  ;;  %p2178_p0 = scmp.ge.s32.totalorder %s2523_s23, 1  ;;  %s2523_s23 = sphi %s2577_s23, %s16_s23   ;;  %s2519_s22 = sphi %s2575_s22, %s3341_s22   ;;  %s2515_s21 = sphi %s2573_s21, %s3340_s21  }
   0x3   : > { %p30_p1 = scmp.ge.s32.totalorder %s28_s24, 2  ;;  %p270_p2 = scmp.lt.s32.totalorder %s2523_s23, 3 }
   0x5   : > { %s3343_s24 = smov (%p30_p1, %s28_s24), 0  ;;  %p271_p3 = pnand %p2178_p0, %p270_p2 }
   0x6   : > { %p332_p4 = scmp.lt.s32.totalorder (!%p271_p3), %s2515_s21, 1  ;;  %s2525_s9 = smov (!%p271_p3), 36  }
   0x7   : > { %274 = sbr.rel (%p271_p3) target bundleno = 817 (0x331), region = 44  ;;  %s2526_s10 = smov (!%p271_p3), 60  }
   0x8   : > { %s2527_s11 = smov (!%p271_p3), 24   ;;  %s2528_s12 = smov (!%p271_p3), 12  }
   0x9   : > { %s2529_s14 = smov (!%p271_p3), 48   ;;  %s2530_s20 = smov (!%p271_p3), 72  }
   0xa   : > { %s2531_s29 = smov (!%p271_p3), 84   ;;  %s2536_s18 = smov (!%p271_p3), 64  }
   0xc   : > { %s3345_s21 = smov (!%p332_p4, %s2515_s21), 1  ;;  %v2471_v0 = vld [vmem:[%s3335_s2 + $0x30] sm:$0x3f]   ;;  %vm1098_vm0 = vcmask 1045504   ;;  %v2473_v2 = vld [vmem:[%s3335_s2 + $0x28] sm:$0xff]   ;;  %vm630_vm1 = vcmask 1046528  }
   0xd   : > { %s2402_s27 = smul.u32 144, %s3345_s21  ;;  %2401 = vmatprep.subr.msk.bf16.mxu0 %vm1098_vm0, %v2471_v0  ;;  %v1100_v1 = vsel %vm1098_vm0, %v2471_v0, 0  ;;  %vm489_vm2 = vsmask.f32 7424  ;;  %v2474_v48 = vld [vmem:[%s3335_s2 + $0x20] sm:$0xff]   ;;  %v2475_v50 = vld [vmem:[%s3335_s2 + $0x18] sm:$0xff]  }
   0xe   : > { %2352 = vmatpush3.bf16.msra.mxu0 %v1100_v1  ;;  %v2476_v53 = vld [vmem:[%s3335_s2 + $0x10] sm:$0xff]   ;;  %v2477_v60 = vld [vmem:[%s3335_s2 + $0x8] sm:$0xff]   ;;  %v2478_v0 = vld [vmem:[%s3335_s2] sm:$0xff]   ;;  %vm847_vm3 = vcmask 97280   ;;  %vm868_vm4 = vcmask 195584   ;;  %vm889_vm5 = vcmask 293888  }
   0xf   : > { %s2602_s30 = scalar_lea.vmem %s3333_s0, %s2402_s27  ;;  %2353 = vmatprep.subr.bf16.mxu0 %v2473_v2  ;;  %s2263_s13 = sadd.s32 96, %s2402_s27  ;;  %vm910_vm6 = vcmask 392192   ;;  %vm931_vm7 = vcmask 490496   ;;  %vm952_vm8 = vcmask 588800   ;;  %vm973_vm9 = vcmask 687104  }
  0x10   : > { %v2608_v3 = vld [vmem:[%s2602_s30 + $0x18] sm:$0xff]   ;;  %v2611_v4 = vld [vmem:[%s2602_s30 + $0xc] sm:$0xff]   ;;  %v2454_v5 = vld [vmem:[%s2602_s30 + $0x14] ss:$0 sps:$4 sm:$0x11]   ;;  %s2656_s17 = scalar_lea.vmem %s3334_s1, %s2263_s13  ;;  %s2532_s13 = smov 96  }
  0x11   : > { %688 = vrot.lane.b32.xlu1 %v2608_v3, %s2525_s9  ;;  %v2617_v6 = vld [vmem:[%s2602_s30] sm:$0xff]   ;;  %686 = vrot.lane.b32.xlu0 %v2611_v4, %s2525_s9  ;;  %v634_v7 = vrot.slane %v2611_v4, 1  ;;  %v635_v8 = vrot.slane %v2454_v5, 1  ;;  %v2456_v9 = vld [vmem:[%s2602_s30 + $0x8] ss:$0 sps:$4 sm:$0x11]  }
  0x12   : > { %2354 = vmatpush3.bf16.msra.mxu0 %v2473_v2  ;;  %v631_v10 = vrot.slane %v2617_v6, 1  ;;  %v491_v11 = vshrl.u32 %v2617_v6, 16  ;;  %v493_v12 = vshll.u32 %v2617_v6, 16  ;;  %v503_v13 = vshrl.u32 %v2611_v4, 16  ;;  %v2637_v33 = vld [vmem:[%s2602_s30 + $0x24] sm:$0xff]   ;;  %v2660_v47 = vld [vmem:[%s2602_s30 + $0x30] sm:$0xff]  }
  0x13   : > { %v636_v14 = vsel %vm630_vm1, %v634_v7, %v635_v8  ;;  %v632_v15 = vrot.slane %v2456_v9, 1  ;;  %v498_v16 = vshll.u32 %v2456_v9, 16  ;;  %v2457_v17 = vld [vmem:[%s2602_s30 + $0x20] ss:$0 sps:$4 sm:$0x11]   ;;  %v505_v18 = vshll.u32 %v2611_v4, 16  ;;  %2355 = vmatprep.subr.bf16.mxu0 %v2474_v48 }
  0x14   : > { %v495_v19 = vrot.slane %v493_v12, 1  ;;  %v510_v20 = vshll.u32 %v2454_v5, 16  ;;  %v517_v21 = vshll.u32 %v2608_v3, 16  ;;  %v637_v26 = vrot.slane %v2608_v3, 1  ;;  %v2696_v1 = vld [vmem:[%s2602_s30 + $0x3c] sm:$0xff]  }
  0x15   : > { %744 = vrot.lane.b32.xlu0 %v636_v14, %s2526_s10  ;;  %v633_v22 = vsel %vm630_vm1, %v631_v10, %v632_v15  ;;  %v500_v23 = vrot.slane %v498_v16, 1  ;;  %v507_v24 = vrot.slane %v505_v18, 1  ;;  %v515_v28 = vshrl.u32 %v2608_v3, 16  ;;  %v2459_v36 = vld [vmem:[%s2602_s30 + $0x2c] ss:$0 sps:$4 sm:$0x11]  }
  0x16   : > { %661 = vrot.lane.b32.xlu1 %v633_v22, %s2527_s11  ;;  %v496_v25 = vor.u32 %v495_v19, %v491_v11  ;;  %v512_v27 = vrot.slane %v510_v20, 1  ;;  %v638_v29 = vrot.slane %v2457_v17, 1  ;;  %v519_v31 = vrot.slane %v517_v21, 1  ;;  %v2461_v49 = vld [vmem:[%s2602_s30 + $0x38] ss:$0 sps:$4 sm:$0x11]   ;;  %2356 = vmatpush3.bf16.msra.mxu0 %v2474_v48 }
  0x17   : > { %v508_v30 = vor.u32 %v507_v24, %v503_v13  ;;  %v522_v32 = vshll.u32 %v2457_v17, 16  ;;  %v529_v40 = vshll.u32 %v2637_v33, 16  ;;  %v527_v42 = vshrl.u32 %v2637_v33, 16  ;;  %2357 = vmatprep.subr.bf16.mxu0 %v2475_v50  ;;  %v2463_v7 = vld [vmem:[%s2602_s30 + $0x44] ss:$0 sps:$4 sm:$0x11]  }
  0x18   : > { %v501_v34 = vsel %vm489_vm2, %v496_v25, %v500_v23  ;;  %v639_v37 = vsel %vm630_vm1, %v637_v26, %v638_v29  ;;  %v520_v38 = vor.u32 %v519_v31, %v515_v28  ;;  %v534_v44 = vshll.u32 %v2459_v36, 16  ;;  %v2721_v18 = vld [vmem:[%s2602_s30 + $0x48] sm:$0xff]   ;;  %v2465_v20 = vld [vmem:[%s2602_s30 + $0x50] ss:$0 sps:$4 sm:$0x11]  }
  0x19   : > { %610 = vrot.lane.b32.xlu0 %v501_v34, %s2528_s12  ;;  %v513_v35 = vsel %vm489_vm2, %v508_v30, %v512_v27  ;;  %v524_v39 = vrot.slane %v522_v32, 1  ;;  %v531_v43 = vrot.slane %v529_v40, 1  ;;  %v541_v52 = vshll.u32 %v2660_v47, 16  ;;  %v2734_v27 = vld [vmem:[%s2602_s30 + $0x54] sm:$0xff]  }
  0x1a   : > { %663 = vrot.lane.b32.xlu1 %v636_v14, %s2527_s11  ;;  %v536_v46 = vrot.slane %v534_v44, 1  ;;  %v546_v54 = vshll.u32 %v2461_v49, 16  ;;  %v640_v55 = vrot.slane %v2637_v33, 1  ;;  %v641_v56 = vrot.slane %v2459_v36, 1  ;;  %2358 = vmatpush3.bf16.msra.mxu0 %v2475_v50 }
  0x1b   : > { %v525_v41 = vsel %vm489_vm2, %v520_v38, %v524_v39  ;;  %v532_v45 = vor.u32 %v531_v43, %v527_v42  ;;  %v539_v57 = vshrl.u32 %v2660_v47, 16  ;;  %v543_v58 = vrot.slane %v541_v52, 1  ;;  %2359 = vmatprep.subr.bf16.mxu0 %v2476_v53  ;;  %v2467_v31 = vld [vmem:[%s2602_s30 + $0x5c] ss:$0 sps:$4 sm:$0x11]   ;;  %v2759_v43 = vld [vmem:[%s2656_s17] sm:$0xff]  }
  0x1c   : > { %v643_v59 = vrot.slane %v2660_v47, 1  ;;  %v548_v61 = vrot.slane %v546_v54, 1  ;;  %v644_v62 = vrot.slane %v2461_v49, 1  ;;  %v642_v63 = vsel %vm630_vm1, %v640_v55, %v641_v56  ;;  %s2535_s30 = smov 32  }
  0x1d   : > { %612 = vrot.lane.b32.xlu0 %v513_v35, %s2528_s12  ;;  %v537_v51 = vsel %vm489_vm2, %v532_v45, %v536_v46  ;;  %v544_v2 = vor.u32 %v543_v58, %v539_v57  ;;  %v553_v8 = vshll.u32 %v2696_v1, 16  ;;  %v551_v10 = vshrl.u32 %v2696_v1, 16  ;;  %v2469_v45 = vld [vmem:[%s2656_s17 + $0x8] ss:$0 sps:$4 sm:$0x11]  }
  0x1e   : > { %746 = vrot.lane.b32.xlu1 %v639_v37, %s2526_s10  ;;  %2360 = vmatpush3.bf16.msra.mxu0 %v2476_v53  ;;  %v645_v9 = vsel %vm630_vm1, %v643_v59, %v644_v62  ;;  %v558_v12 = vshll.u32 %v2463_v7, 16  ;;  %v646_v16 = vrot.slane %v2696_v1, 1  ;;  %v647_v17 = vrot.slane %v2463_v7, 1  ;;  %v2772_v53 = vld [vmem:[%s2656_s17 + $0xc] sm:$0xff]  }
  0x1f   : > { %2361 = vmatprep.subr.bf16.mxu0 %v2477_v60  ;;  %v549_v5 = vsel %vm489_vm2, %v544_v2, %v548_v61  ;;  %v555_v11 = vrot.slane %v553_v8, 1  ;;  %v565_v21 = vshll.u32 %v2721_v18, 16  ;;  %v563_v22 = vshrl.u32 %v2721_v18, 16  ;;  %v2472_v57 = vld [vmem:[%s2656_s17 + $0x14] ss:$0 sps:$4 sm:$0x11]  }
  0x20   : > { %v560_v14 = vrot.slane %v558_v12, 1  ;;  %v648_v19 = vsel %vm630_vm1, %v646_v16, %v647_v17  ;;  %v570_v24 = vshll.u32 %v2465_v20, 16  ;;  %v649_v29 = vrot.slane %v2721_v18, 1 }
  0x21   : > { %721 = vrot.lane.b32.xlu0 %v513_v35, %s2529_s14  ;;  %v556_v13 = vor.u32 %v555_v11, %v551_v10  ;;  %v567_v23 = vrot.slane %v565_v21, 1  ;;  %v650_v30 = vrot.slane %v2465_v20, 1  ;;  %v577_v32 = vshll.u32 %v2734_v27, 16 }
  0x22   : > { %723 = vrot.lane.b32.xlu1 %v525_v41, %s2529_s14  ;;  %2362 = vmatpush3.bf16.msra.mxu0 %v2477_v60  ;;  %v572_v26 = vrot.slane %v570_v24, 1  ;;  %v575_v35 = vshrl.u32 %v2734_v27, 16  ;;  %v653_v42 = vrot.slane %v2467_v31, 1  ;;  %v589_v46 = vshll.u32 %v2759_v43, 16 }
  0x23   : > { %2363 = vmatprep.subr.bf16.mxu0 %v2478_v0  ;;  %v561_v15 = vsel %vm489_vm2, %v556_v13, %v560_v14  ;;  %v568_v25 = vor.u32 %v567_v23, %v563_v22  ;;  %v651_v34 = vsel %vm630_vm1, %v649_v29, %v650_v30  ;;  %v579_v36 = vrot.slane %v577_v32, 1 }
  0x24   : > { %v587_v48 = vshrl.u32 %v2759_v43, 16  ;;  %v591_v49 = vrot.slane %v589_v46, 1  ;;  %v594_v50 = vshll.u32 %v2469_v45, 16  ;;  %v655_v55 = vrot.slane %v2759_v43, 1 }
  0x25   : > { %769 = vrot.lane.b32.xlu0 %v2608_v3, %s2530_s20  ;;  %v573_v28 = vsel %vm489_vm2, %v568_v25, %v572_v26  ;;  %v580_v38 = vor.u32 %v579_v36, %v575_v35  ;;  %v656_v56 = vrot.slane %v2469_v45, 1  ;;  %v601_v58 = vshll.u32 %v2772_v53, 16 }
  0x26   : > { %771 = vrot.lane.b32.xlu1 %v2637_v33, %s2530_s20  ;;  %2364 = vmatpush3.bf16.msra.mxu0 %v2478_v0  ;;  %v596_v52 = vrot.slane %v594_v50, 1  ;;  %v599_v60 = vshrl.u32 %v2772_v53, 16  ;;  %v606_v62 = vshll.u32 %v2472_v57, 16  ;;  %v659_v10 = vrot.slane %v2472_v57, 1 }
  0x27   : > { %v2785_v59 = vsel %vm630_vm1, %v655_v55, %v656_v56  ;;  %v603_v61 = vrot.slane %v601_v58, 1  ;;  %v2534_v17 = vmov 0   ;;  %vm994_vm10 = vcmask 785408  }
  0x28   : > { %vm1077_vm11 = vcmask 883712   ;;  %vm1588_vm12 = vcmask 261120   ;;  %vm1605_vm13 = vcmask 523264  }
  0x29   : > { %804 = vrot.lane.b32.xlu0 %v525_v41, %s2531_s29  ;;  %v604_v2 = vor.u32 %v603_v61, %v599_v60 }
  0x2a   : > { %806 = vrot.lane.b32.xlu1 %v537_v51, %s2531_s29 }
  0x2d   : > { %827 = vrot.lane.b32.xlu0 %v639_v37, %s2532_s13 }
  0x2e   : > { %614 = vrot.lane.b32.xlu1 %v525_v41, %s2528_s12  ;;  %v652_v41 = vrot.slane %v2734_v27, 1 }
  0x30   : > { %v654_v44 = vsel %vm630_vm1, %v652_v41, %v653_v42 }
  0x31   : > { %829 = vrot.lane.b32.xlu0 %v642_v63, %s2532_s13 }
  0x32   : > { %616 = vrot.lane.b32.xlu1 %v537_v51, %s2528_s12 }
  0x35   : > { %665 = vrot.lane.b32.xlu0 %v639_v37, %s2527_s11  ;;  %v582_v37 = vshll.u32 %v2467_v31, 16 }
  0x36   : > { %667 = vrot.lane.b32.xlu1 %v642_v63, %s2527_s11 }
  0x37   : > { %v584_v39 = vrot.slane %v582_v37, 1 }
  0x39   : > { %690 = vrot.lane.b32.xlu0 %v2637_v33, %s2525_s9  ;;  %v585_v40 = vsel %vm489_vm2, %v580_v38, %v584_v39 }
  0x3a   : > { %692 = vrot.lane.b32.xlu1 %v2660_v47, %s2525_s9 }
  0x3d   : > { %725 = vrot.lane.b32.xlu0 %v537_v51, %s2529_s14  ;;  %v592_v51 = vor.u32 %v591_v49, %v587_v48 }
  0x3e   : > { %727 = vrot.lane.b32.xlu1 %v549_v5, %s2529_s14 }
  0x3f   : > { %v597_v54 = vsel %vm489_vm2, %v592_v51, %v596_v52 }
  0x41   : > { %748 = vrot.lane.b32.xlu0 %v642_v63, %s2526_s10 }
  0x42   : > { %750 = vrot.lane.b32.xlu1 %v645_v9, %s2526_s10 }
  0x45   : > { %773 = vrot.lane.b32.xlu0 %v2660_v47, %s2530_s20 }
  0x46   : > { %775 = vrot.lane.b32.xlu1 %v2696_v1, %s2530_s20 }
  0x49   : > { %808 = vrot.lane.b32.xlu0 %v549_v5, %s2531_s29 }
  0x4a   : > { %810 = vrot.lane.b32.xlu1 %v561_v15, %s2531_s29 }
  0x4d   : > { %831 = vrot.lane.b32.xlu0 %v645_v9, %s2532_s13 }
  0x4e   : > { %618 = vrot.lane.b32.xlu1 %v549_v5, %s2528_s12  ;;  %v608_v5 = vrot.slane %v606_v62, 1 }
  0x50   : > { %v2796_v8 = vsel %vm489_vm2, %v604_v2, %v608_v5 }
  0x51   : > { %833 = vrot.lane.b32.xlu0 %v648_v19, %s2532_s13 }
  0x52   : > { %620 = vrot.lane.b32.xlu1 %v561_v15, %s2528_s12 }
  0x55   : > { %669 = vrot.lane.b32.xlu0 %v645_v9, %s2527_s11  ;;  %v658_v9 = vrot.slane %v2772_v53, 1 }
  0x56   : > { %671 = vrot.lane.b32.xlu1 %v648_v19, %s2527_s11 }
  0x57   : > { %v2803_v13 = vsel %vm630_vm1, %v658_v9, %v659_v10 }
  0x59   : > { %694 = vrot.lane.b32.xlu0 %v2696_v1, %s2525_s9 }
  0x5a   : > { %696 = vrot.lane.b32.xlu1 %v2721_v18, %s2525_s9 }
  0x5d   : > { %729 = vrot.lane.b32.xlu0 %v561_v15, %s2529_s14  ;;  %v2533_v15 = vmov 0.0|0.0  }
  0x5e   : > { %731 = vrot.lane.b32.xlu1 %v573_v28, %s2529_s14  ;;  %v2808_v16 = vrot.slane %v2533_v15, 1 }
  0x61   : > { %752 = vrot.lane.b32.xlu0 %v648_v19, %s2526_s10  ;;  %v2810_v19 = vrot.slane %v2534_v17, 1 }
  0x62   : > { %754 = vrot.lane.b32.xlu1 %v651_v34, %s2526_s10 }
  0x63   : > { %v2818_v22 = vpack.i.bf16 %v2810_v19, %v2810_v19 }
  0x65   : > { %777 = vrot.lane.b32.xlu0 %v2721_v18, %s2530_s20 }
  0x66   : > { %779 = vrot.lane.b32.xlu1 %v2734_v27, %s2530_s20 }
  0x69   : > { %812 = vrot.lane.b32.xlu0 %v573_v28, %s2531_s29 }
  0x6a   : > { %814 = vrot.lane.b32.xlu1 %v585_v40, %s2531_s29 }
  0x6d   : > { %835 = vrot.lane.b32.xlu0 %v651_v34, %s2532_s13 }
  0x6e   : > { %622 = vrot.lane.b32.xlu1 %v573_v28, %s2528_s12 }
  0x71   : > { %837 = vrot.lane.b32.xlu0 %v654_v44, %s2532_s13 }
  0x72   : > { %624 = vrot.lane.b32.xlu1 %v585_v40, %s2528_s12 }
  0x75   : > { %673 = vrot.lane.b32.xlu0 %v651_v34, %s2527_s11 }
  0x76   : > { %675 = vrot.lane.b32.xlu1 %v654_v44, %s2527_s11 }
  0x79   : > { %698 = vrot.lane.b32.xlu0 %v2734_v27, %s2525_s9 }
  0x7a   : > { %700 = vrot.lane.b32.xlu1 %v2759_v43, %s2525_s9 }
  0x7d   : > { %733 = vrot.lane.b32.xlu0 %v585_v40, %s2529_s14 }
  0x7e   : > { %735 = vrot.lane.b32.xlu1 %v597_v54, %s2529_s14 }
  0x81   : > { %756 = vrot.lane.b32.xlu0 %v654_v44, %s2526_s10 }
  0x82   : > { %758 = vrot.lane.b32.xlu1 %v2785_v59, %s2526_s10 }
  0x83   : > { %v689_v63 = vpop.permute.xlu1 %688  ;;  %v687_v0 = vpop.permute.xlu0 %686 }
  0x85   : > { %781 = vrot.lane.b32.xlu0 %v2759_v43, %s2530_s20 }
  0x86   : > { %783 = vrot.lane.b32.xlu1 %v2772_v53, %s2530_s20 }
  0x87   : > { %v745_v7 = vpop.permute.xlu0 %744 }
  0x88   : > { %v662_v11 = vpop.permute.xlu1 %661 }
  0x89   : > { %816 = vrot.lane.b32.xlu0 %v597_v54, %s2531_s29 }
  0x8a   : > { %818 = vrot.lane.b32.xlu1 %v2796_v8, %s2531_s29 }
  0x8b   : > { %v611_v12 = vpop.permute.xlu0 %610 }
  0x8c   : > { %v664_v14 = vpop.permute.xlu1 %663  ;;  %v849_v23 = vsel %vm847_vm3, %v2617_v6, %v611_v12 }
  0x8d   : > { %839 = vrot.lane.b32.xlu0 %v2785_v59, %s2532_s13  ;;  %v870_v28 = vsel %vm868_vm4, %v849_v23, %v662_v11 }
  0x8e   : > { %841 = vrot.lane.b32.xlu1 %v2803_v13, %s2532_s13  ;;  %v891_v6 = vsel %vm889_vm5, %v870_v28, %v687_v0 }
  0x8f   : > { %v613_v20 = vpop.permute.xlu0 %612 }
  0x90   : > { %v747_v21 = vpop.permute.xlu1 %746  ;;  %v851_v26 = vsel %vm847_vm3, %v2611_v4, %v613_v20 }
  0x91   : > { %1531 = vrot.lane.b32.xlu0 %v2808_v16, %s2535_s30  ;;  %v872_v30 = vsel %vm868_vm4, %v851_v26, %v664_v14 }
  0x92   : > { %1490 = vrot.lane.b32.xlu1 %v2808_v16, %s2536_s18  ;;  %v893_v32 = vsel %vm889_vm5, %v872_v30, %v689_v63 }
  0x93   : > { %v722_v24 = vpop.permute.xlu0 %721 }
  0x94   : > { %v724_v25 = vpop.permute.xlu1 %723  ;;  %v912_v4 = vsel %vm910_vm6, %v891_v6, %v722_v24 }
  0x95   : > { %2443 = vrot.lane.b32.xlu0 %v2818_v22, %s2535_s30  ;;  %v933_v36 = vsel %vm931_vm7, %v912_v4, %v745_v7  ;;  %v914_v37 = vsel %vm910_vm6, %v893_v32, %v724_v25 }
  0x96   : > { %1507 = vrot.lane.b32.xlu1 %v2533_v15, %s2532_s13  ;;  %v935_v44 = vsel %vm931_vm7, %v914_v37, %v747_v21 }
  0x97   : > { %v770_v29 = vpop.permute.xlu0 %769 }
  0x98   : > { %v772_v31 = vpop.permute.xlu1 %771  ;;  %v954_v38 = vsel %vm952_vm8, %v933_v36, %v770_v29 }
  0x99   : > { %1492 = vrot.lane.b32.xlu0 %v2808_v16, %s2536_s18  ;;  %v956_v45 = vsel %vm952_vm8, %v935_v44, %v772_v31 }
  0x9a   : > { %626 = vrot.lane.b32.xlu1 %v597_v54, %s2528_s12 }
  0x9b   : > { %v805_v34 = vpop.permute.xlu0 %804 }
  0x9c   : > { %v807_v35 = vpop.permute.xlu1 %806  ;;  %v975_v39 = vsel %vm973_vm9, %v954_v38, %v805_v34 }
  0x9d   : > { %628 = vrot.lane.b32.xlu0 %v2796_v8, %s2528_s12  ;;  %v977_v46 = vsel %vm973_vm9, %v956_v45, %v807_v35 }
  0x9e   : > { %677 = vrot.lane.b32.xlu1 %v2785_v59, %s2527_s11 }
  0x9f   : > { %v828_v40 = vpop.permute.xlu0 %827 }
  0xa0   : > { %v615_v41 = vpop.permute.xlu1 %614  ;;  %v996_v42 = vsel %vm994_vm10, %v975_v39, %v828_v40 }
  0xa1   : > { %2365 = vmatprep.mubr.msk.bf16.mxu0 %vm1077_vm11, %v996_v42  ;;  %679 = vrot.lane.b32.xlu0 %v2803_v13, %s2527_s11  ;;  %v853_v62 = vsel %vm847_vm3, %v2608_v3, %v615_v41 }
  0xa2   : > { %702 = vrot.lane.b32.xlu1 %v2772_v53, %s2525_s9 }
  0xa3   : > { %v830_v48 = vpop.permute.xlu0 %829 }
  0xa4   : > { %v617_v49 = vpop.permute.xlu1 %616  ;;  %v998_v50 = vsel %vm994_vm10, %v977_v46, %v830_v48 }
  0xa5   : > { %2366 = vmatmul.mubr.msk.bf16.vlgmr.msra.gmra.mxu0 %vm1077_vm11, %v998_v50 }
  0xa6   : > { %737 = vrot.lane.b32.xlu1 %v2796_v8, %s2529_s14  ;;  %v855_v8 = vsel %vm847_vm3, %v2637_v33, %v617_v49 }
  0xa7   : > { %v666_v51 = vpop.permute.xlu0 %665 }
  0xa8   : > { %v668_v52 = vpop.permute.xlu1 %667  ;;  %v874_v63 = vsel %vm868_vm4, %v853_v62, %v666_v51 }
  0xa9   : > { %v876_v10 = vsel %vm868_vm4, %v855_v8, %v668_v52 }
  0xaa   : > { %1545 = vrot.lane.b32.xlu1 %v2808_v16, %s2535_s30 }
  0xab   : > { %v691_v54 = vpop.permute.xlu0 %690 }
  0xac   : > { %v693_v55 = vpop.permute.xlu1 %692  ;;  %v895_v0 = vsel %vm889_vm5, %v874_v63, %v691_v54  ;;  %v2480_v63 = vld [vmem:[%s2656_s17 + $0x20] ss:$0 sps:$4 sm:$0x11]  }
  0xad   : > { %v897_v12 = vsel %vm889_vm5, %v876_v10, %v693_v55  ;;  %v717_v8 = vshll.u32 %v2480_v63, 16 }
  0xae   : > { %760 = vrot.lane.b32.xlu1 %v2803_v13, %s2526_s10 }
  0xaf   : > { %v726_v56 = vpop.permute.xlu0 %725 }
  0xb0   : > { %v728_v57 = vpop.permute.xlu1 %727  ;;  %v916_v5 = vsel %vm910_vm6, %v895_v0, %v726_v56 }
  0xb1   : > { %v918_v14 = vsel %vm910_vm6, %v897_v12, %v728_v57  ;;  %v719_v12 = vrot.slane %v717_v8, 1 }
  0xb2   : > { %1562 = vrot.lane.b32.xlu1 %v2533_v15, %s2536_s18 }
  0xb3   : > { %v749_v58 = vpop.permute.xlu0 %748 }
  0xb4   : > { %v751_v59 = vpop.permute.xlu1 %750  ;;  %v937_v9 = vsel %vm931_vm7, %v916_v5, %v749_v58 }
  0xb5   : > { %v939_v21 = vsel %vm931_vm7, %v918_v14, %v751_v59 }
  0xb7   : > { %v774_v60 = vpop.permute.xlu0 %773 }
  0xb8   : > { %v776_v61 = vpop.permute.xlu1 %775  ;;  %v958_v11 = vsel %vm952_vm8, %v937_v9, %v774_v60  ;;  %v2910_v9 = vld [vmem:[%s2656_s17 + $0x24] sm:$0xff]  }
  0xb9   : > { %v960_v33 = vsel %vm952_vm8, %v939_v21, %v776_v61  ;;  %v2479_v61 = vld [vmem:[%s2656_s17 + $0x18] sm:$0xff]  }
  0xba   : > { %704 = vrot.lane.b32.xlu0 %v2479_v61, %s2525_s9  ;;  %v712_v0 = vshll.u32 %v2479_v61, 16  ;;  %785 = vrot.lane.b32.xlu1 %v2479_v61, %s2530_s20  ;;  %v710_v5 = vshrl.u32 %v2479_v61, 16 }
  0xbb   : > { %v809_v2 = vpop.permute.xlu0 %808 }
  0xbc   : > { %v811_v7 = vpop.permute.xlu1 %810  ;;  %v979_v3 = vsel %vm973_vm9, %v958_v11, %v809_v2 }
  0xbd   : > { %v981_v23 = vsel %vm973_vm9, %v960_v33, %v811_v7  ;;  %v714_v7 = vrot.slane %v712_v0, 1 }
  0xbe   : > { %787 = vrot.lane.b32.xlu1 %v2910_v9, %s2530_s20 }
  0xbf   : > { %v832_v13 = vpop.permute.xlu0 %831  ;;  %v715_v11 = vor.u32 %v714_v7, %v710_v5 }
  0xc0   : > { %v619_v17 = vpop.permute.xlu1 %618  ;;  %v1000_v20 = vsel %vm994_vm10, %v979_v3, %v832_v13 }
  0xc1   : > { %2369 = vmatprep.mubr.msk.bf16.mxu0 %vm1077_vm11, %v1000_v20  ;;  %v857_v37 = vsel %vm847_vm3, %v2660_v47, %v619_v17  ;;  %v720_v13 = vsel %vm489_vm2, %v715_v11, %v719_v12  ;;  %v741_v17 = vrot.slane %v2479_v61, 1  ;;  %v742_v20 = vrot.slane %v2480_v63, 1  ;;  %v2483_v11 = vld [vmem:[%s3337_s4 + $0x78] sm:$0xff]  }
  0xc2   : > { %739 = vrot.lane.b32.xlu0 %v720_v13, %s2529_s14  ;;  %v2484_v12 = vld [vmem:[%s3337_s4 + $0x38] sm:$0xff]   ;;  %2305 = vmatprep.subr.bf16.mxu1 %v2483_v11 }
  0xc3   : > { %v834_v24 = vpop.permute.xlu0 %833  ;;  %2306 = vmatpush3.bf16.msra.mxu1 %v2484_v12 }
  0xc4   : > { %v621_v25 = vpop.permute.xlu1 %620  ;;  %v1002_v26 = vsel %vm994_vm10, %v981_v23, %v834_v24  ;;  %v2919_v23 = vsel %vm630_vm1, %v741_v17, %v742_v20 }
  0xc5   : > { %2370 = vmatmul.mubr.msk.bf16.gmra.mxu0 %vm1077_vm11, %v1002_v26  ;;  %v859_v44 = vsel %vm847_vm3, %v2696_v1, %v621_v25 }
  0xc6   : > { %1560 = vrot.lane.b32.xlu0 %v2533_v15, %s2536_s18 }
  0xc7   : > { %v670_v28 = vpop.permute.xlu0 %669 }
  0xc8   : > { %v672_v29 = vpop.permute.xlu1 %671  ;;  %v878_v38 = vsel %vm868_vm4, %v857_v37, %v670_v28 }
  0xc9   : > { %v880_v46 = vsel %vm868_vm4, %v859_v44, %v672_v29 }
  0xca   : > { %762 = vrot.lane.b32.xlu0 %v2919_v23, %s2526_s10 }
  0xcb   : > { %v695_v30 = vpop.permute.xlu0 %694 }
  0xcc   : > { %v697_v31 = vpop.permute.xlu1 %696  ;;  %v899_v39 = vsel %vm889_vm5, %v878_v38, %v695_v30 }
  0xcd   : > { %v901_v47 = vsel %vm889_vm5, %v880_v46, %v697_v31 }
  0xce   : > { %2448 = vrot.lane.b32.xlu0 %v2818_v22, %s2532_s13 }
  0xcf   : > { %v730_v6 = vpop.permute.xlu0 %729 }
  0xd0   : > { %v732_v4 = vpop.permute.xlu1 %731  ;;  %v920_v41 = vsel %vm910_vm6, %v899_v39, %v730_v6 }
  0xd1   : > { %v922_v51 = vsel %vm910_vm6, %v901_v47, %v732_v4 }
  0xd2   : > { %820 = vrot.lane.b32.xlu0 %v720_v13, %s2531_s29 }
  0xd3   : > { %v753_v32 = vpop.permute.xlu0 %752 }
  0xd4   : > { %v755_v34 = vpop.permute.xlu1 %754  ;;  %v941_v45 = vsel %vm931_vm7, %v920_v41, %v753_v32 }
  0xd5   : > { %v943_v1 = vsel %vm931_vm7, %v922_v51, %v755_v34 }
  0xd7   : > { %v778_v35 = vpop.permute.xlu0 %777 }
  0xd8   : > { %v780_v36 = vpop.permute.xlu1 %779  ;;  %v962_v48 = vsel %vm952_vm8, %v941_v45, %v778_v35 }
  0xd9   : > { %v964_v55 = vsel %vm952_vm8, %v943_v1, %v780_v36 }
  0xdb   : > { %v813_v40 = vpop.permute.xlu0 %812 }
  0xdc   : > { %v815_v42 = vpop.permute.xlu1 %814  ;;  %v983_v49 = vsel %vm973_vm9, %v962_v48, %v813_v40 }
  0xdd   : > { %v985_v56 = vsel %vm973_vm9, %v964_v55, %v815_v42 }
  0xdf   : > { %v836_v50 = vpop.permute.xlu0 %835 }
  0xe0   : > { %v623_v52 = vpop.permute.xlu1 %622  ;;  %v1004_v54 = vsel %vm994_vm10, %v983_v49, %v836_v50 }
  0xe1   : > { %2373 = vmatprep.mubr.msk.bf16.mxu0 %vm1077_vm11, %v1004_v54  ;;  %v861_v26 = vsel %vm847_vm3, %v2721_v18, %v623_v52 }
  0xe3   : > { %v838_v57 = vpop.permute.xlu0 %837 }
  0xe4   : > { %v625_v58 = vpop.permute.xlu1 %624  ;;  %v1006_v59 = vsel %vm994_vm10, %v985_v56, %v838_v57 }
  0xe5   : > { %2374 = vmatmul.mubr.msk.bf16.gmra.mxu0 %vm1077_vm11, %v1006_v59  ;;  %v863_v28 = vsel %vm847_vm3, %v2734_v27, %v625_v58 }
  0xe7   : > { %v674_v60 = vpop.permute.xlu0 %673 }
  0xe8   : > { %v676_v62 = vpop.permute.xlu1 %675  ;;  %v882_v29 = vsel %vm868_vm4, %v861_v26, %v674_v60 }
  0xe9   : > { %v884_v30 = vsel %vm868_vm4, %v863_v28, %v676_v62 }
  0xeb   : > { %v699_v2 = vpop.permute.xlu0 %698 }
  0xec   : > { %v701_v10 = vpop.permute.xlu1 %700  ;;  %v903_v31 = vsel %vm889_vm5, %v882_v29, %v699_v2 }
  0xed   : > { %v905_v4 = vsel %vm889_vm5, %v884_v30, %v701_v10  ;;  %v1227_v30 = vlaneseq }
  0xef   : > { %v734_v3 = vpop.permute.xlu0 %733 }
  0xf0   : > { %v736_v14 = vpop.permute.xlu1 %735  ;;  %v924_v32 = vsel %vm910_vm6, %v903_v31, %v734_v3  ;;  %v2485_v3 = vld [vmem:[%s3337_s4 + $0x70] sm:$0xff]   ;;  %v2487_v31 = vld [vmem:[%s3337_s4 + $0x68] sm:$0xff]  }
  0xf1   : > { %v926_v18 = vsel %vm910_vm6, %v905_v4, %v736_v14  ;;  %2307 = vmatprep.subr.bf16.mxu1 %v2485_v3 }
  0xf3   : > { %v757_v21 = vpop.permute.xlu0 %756 }
  0xf4   : > { %v759_v33 = vpop.permute.xlu1 %758  ;;  %v945_v35 = vsel %vm931_vm7, %v924_v32, %v757_v21  ;;  %v3002_v32 = vshrl.u32 %v1227_v30, 7 }
  0xf5   : > { %v947_v27 = vsel %vm931_vm7, %v926_v18, %v759_v33  ;;  %v2490_v18 = vld [vmem:[%s3337_s4 + $0x20] sm:$0xff]  }
  0xf6   : > { %vm1260_vm14 = vcmp.ge.s32.totalorder %v3002_v32, 2 }
  0xf7   : > { %v782_v24 = vpop.permute.xlu0 %781 }
  0xf8   : > { %v784_v25 = vpop.permute.xlu1 %783  ;;  %v966_v36 = vsel %vm952_vm8, %v945_v35, %v782_v24  ;;  %v2486_v24 = vld [vmem:[%s3337_s4 + $0x30] sm:$0xff]   ;;  %v3013_v35 = vld [vmem:[%s3336_s3] ss:$0 sm:$0xff] }
  0xf9   : > { %v968_v37 = vsel %vm952_vm8, %v947_v27, %v784_v25  ;;  %2308 = vmatpush3.bf16.msra.mxu1 %v2486_v24 }
  0xfa   : > { %2309 = vmatprep.subr.bf16.mxu1 %v2487_v31 }
  0xfb   : > { %v817_v6 = vpop.permute.xlu0 %816 }
  0xfc   : > { %v819_v34 = vpop.permute.xlu1 %818  ;;  %v987_v38 = vsel %vm973_vm9, %v966_v36, %v817_v6  ;;  %v2488_v6 = vld [vmem:[%s3337_s4 + $0x28] sm:$0xff]   ;;  %v2491_v36 = vld [vmem:[%s3337_s4 + $0x58] sm:$0xff]  }
  0xfd   : > { %v989_v40 = vsel %vm973_vm9, %v968_v37, %v819_v34  ;;  %2310 = vmatpush3.bf16.msra.mxu1 %v2488_v6  ;;  %v2489_v34 = vld [vmem:[%s3337_s4 + $0x60] sm:$0xff]  }
  0xfe   : > { %2311 = vmatprep.subr.bf16.mxu1 %v2489_v34 }
  0xff   : > { %v840_v39 = vpop.permute.xlu0 %839 }
 0x100   : > { %v842_v41 = vpop.permute.xlu1 %841  ;;  %v1008_v42 = vsel %vm994_vm10, %v987_v38, %v840_v39  ;;  %v2492_v38 = vld [vmem:[%s3337_s4 + $0x18] sm:$0xff]  }
 0x101   : > { %v1010_v22 = vsel %vm994_vm10, %v989_v40, %v842_v41  ;;  %2377 = vmatprep.mubr.msk.bf16.mxu0 %vm1077_vm11, %v1008_v42  ;;  %2312 = vmatpush3.bf16.msra.mxu1 %v2490_v18  ;;  %v2537_v42 = vmov 0.0  }
 0x102   : > { %2378 = vmatmul.mubr.msk.bf16.gmra.mxu0 %vm1077_vm11, %v1010_v22  ;;  %2313 = vmatprep.subr.bf16.mxu1 %v2491_v36 }
 0x103   : > { %v2946_v44 = vpop.permute.xlu0 %1531 }
 0x104   : > { %v2948_v45 = vpop.permute.xlu1 %1490 }
 0x105   : > { %2314 = vmatpush3.bf16.msra.mxu1 %v2492_v38 }
 0x107   : > { %v2950_v46 = vpop.permute.xlu0 %2443 }
 0x108   : > { %v2952_v48 = vpop.permute.xlu1 %1507 }
 0x10b   : > { %v2954_v47 = vpop.permute.xlu0 %1492 }
 0x10c   : > { %v627_v49 = vpop.permute.xlu1 %626 }
 0x10d   : > { %v865_v50 = vsel %vm847_vm3, %v2759_v43, %v627_v49 }
 0x10f   : > { %v629_v51 = vpop.permute.xlu0 %628 }
 0x110   : > { %v867_v52 = vsel %vm847_vm3, %v2772_v53, %v629_v51  ;;  %v678_v54 = vpop.permute.xlu1 %677 }
 0x111   : > { %v886_v1 = vsel %vm868_vm4, %v865_v50, %v678_v54  ;;  %v2493_v50 = vld [vmem:[%s3337_s4 + $0x50] sm:$0xff]  }
 0x112   : > { %2315 = vmatprep.subr.bf16.mxu1 %v2493_v50 }
 0x113   : > { %v680_v55 = vpop.permute.xlu0 %679 }
 0x114   : > { %v888_v56 = vsel %vm868_vm4, %v867_v52, %v680_v55  ;;  %v703_v57 = vpop.permute.xlu1 %702  ;;  %v2494_v52 = vld [vmem:[%s3337_s4 + $0x10] sm:$0xff]  }
 0x115   : > { %v907_v58 = vsel %vm889_vm5, %v886_v1, %v703_v57  ;;  %2316 = vmatpush3.bf16.msra.mxu1 %v2494_v52 }
 0x118   : > { %v738_v61 = vpop.permute.xlu1 %737 }
 0x119   : > { %v928_v62 = vsel %vm910_vm6, %v907_v58, %v738_v61  ;;  %v2495_v58 = vld [vmem:[%s3337_s4 + $0x48] sm:$0xff]  }
 0x11a   : > { %2317 = vmatprep.subr.bf16.mxu1 %v2495_v58 }
 0x11c   : > { %v1546_v63 = vpop.permute.xlu1 %1545 }
 0x11d   : > { %v1661_v10 = vsel %vm1588_vm12, %v2810_v19, %v1546_v63 }
 0x120   : > { %v761_v5 = vpop.permute.xlu1 %760 }
 0x121   : > { %v949_v8 = vsel %vm931_vm7, %v928_v62, %v761_v5  ;;  %v2497_v62 = vld [vmem:[%s3337_s4 + $0x40] sm:$0xff]  }
 0x124   : > { %v1563_v17 = vpop.permute.xlu1 %1562 }
 0x125   : > { %v1677_v33 = vsel %vm1605_vm13, %v1661_v10, %v1563_v17 }
 0x12c   : > { %v705_v59 = vpop.permute.xlu0 %704  ;;  %v786_v25 = vpop.permute.xlu1 %785 }
 0x12d   : > { %v909_v60 = vsel %vm889_vm5, %v888_v56, %v705_v59  ;;  %v2988_v26 = vsel %vm952_vm8, %v949_v8, %v786_v25  ;;  %v2496_v59 = vld [vmem:[%s3337_s4 + $0x8] sm:$0xff]  }
 0x12e   : > { %2318 = vmatpush3.bf16.msra.mxu1 %v2496_v59 }
 0x12f   : > { %2319 = vmatprep.subr.bf16.mxu1 %v2497_v62 }
 0x134   : > { %v740_v43 = vpop.permute.xlu0 %739 }
 0x135   : > { %v930_v0 = vsel %vm910_vm6, %v909_v60, %v740_v43  ;;  %v2498_v43 = vld [vmem:[%s3337_s4] sm:$0xff]  }
 0x136   : > { %2320 = vmatpush3.bf16.msra.mxu1 %v2498_v43 }
 0x138   : > { %v2966_v2 = vpop.permute.xlu0 %1560 }
 0x13c   : > { %v763_v14 = vpop.permute.xlu0 %762 }
 0x13d   : > { %v2981_v21 = vsel %vm931_vm7, %v930_v0, %v763_v14 }
 0x140   : > { %v2990_v28 = vpop.permute.xlu0 %2448 }
 0x141   : > { %v2451_v29 = vunpack.i.h.bf16 %v2990_v28 }
 0x143   : > { %v3000_v4 = vsel %vm994_vm10, %v1677_v33, %v2451_v29 }
 0x165   : > { %v2367_v53 = vpop.f32.mrf.mxu0 }
 0x167   : > { %v1136_v7 = vpop.f32.mrf.mxu0 }
 0x169   : > { %v2368_v13 = vpop.f32.mrf.mxu0 }
 0x16b   : > { %v1139_v20 = vpop.f32.mrf.mxu0 }
 0x185   : > { %v2371_v27 = vpop.f32.mrf.mxu0 }
 0x186   : > { %v1161_v37 = vadd.f32 %v2371_v27, %v3013_v35 }
 0x187   : > { %v1152_v39 = vpop.f32.mrf.mxu0 }
 0x188   : > { %v1378_v40 = vsel %vm1260_vm14, %v1161_v37, 0.0  ;;  %v1153_v41 = vadd.f32 %v3013_v35, %v1152_v39  ;;  %v3139_v39 = vld [vmem:[%s3337_s4 + $0x88] sm:$0xff]  }
 0x189   : > { %v3027_v22 = vpack.c.bf16 %v2537_v42, %v1378_v40  ;;  %v2372_v49 = vpop.f32.mrf.mxu0  ;;  %2385 = vmatprep.subr.bf16.mxu0 %v3139_v39  ;;  %2397 = vmatprep.subr.bf16.mxu1 %v3139_v39 }
 0x18a   : > { %v1376_v51 = vsel %vm1260_vm14, %v1153_v41, 0.0  ;;  %2386 = vmatpush3.bf16.msra.mxu0 %v3139_v39 }
 0x18b   : > { %v3038_v54 = vpack.c.bf16 %v2537_v42, %v1376_v51  ;;  %1511 = vrot.lane.b32.xlu1 %v3027_v22, %s2532_s13  ;;  %1550 = vrot.lane.b32.xlu0 %v3027_v22, %s2536_s18  ;;  %v1155_v1 = vpop.f32.mrf.mxu0  ;;  %v3045_v55 = vrot.slane %v3027_v22, 1  ;;  %v1426_v56 = vshll.u32 %v3027_v22, 16  ;;  %v1424_v63 = vshrl.u32 %v3027_v22, 16 }
 0x18d   : > { %v3049_v57 = vrot.slane %v3038_v54, 1  ;;  %v1428_v61 = vrot.slane %v1426_v56, 1  ;;  %v1419_v53 = vshll.u32 %v3038_v54, 16  ;;  %v1417_v7 = vshrl.u32 %v3038_v54, 16 }
 0x18f   : > { %1509 = vrot.lane.b32.xlu0 %v3038_v54, %s2532_s13  ;;  %1548 = vrot.lane.b32.xlu1 %v3038_v54, %s2536_s18  ;;  %v2228_v60 = vcombine.low %v3049_v57, %v3045_v55  ;;  %v3074_v0 = vor.u32 %v1428_v61, %v1424_v63  ;;  %v1421_v5 = vrot.slane %v1419_v53, 1  ;;  %v2482_v53 = vld [vmem:[%s2656_s17 + $0x2c] ss:$0 sps:$4 sm:$0x11]  }
 0x191   : > { %v3086_v8 = vor.u32 %v1421_v5, %v1417_v7  ;;  %v795_v5 = vshll.u32 %v2910_v9, 16 }
 0x193   : > { %1496 = vrot.lane.b32.xlu0 %v3045_v55, %s2536_s18  ;;  %1535 = vrot.lane.b32.xlu1 %v3045_v55, %s2535_s30 }
 0x197   : > { %1573 = vrot.lane.b32.xlu0 %v3074_v0, %s2532_s13  ;;  %1533 = vrot.lane.b32.xlu1 %v3049_v57, %s2535_s30 }
 0x19b   : > { %1464 = vrot.lane.b32.xlu0 %v3074_v0, %s2535_s30  ;;  %1494 = vrot.lane.b32.xlu1 %v3049_v57, %s2536_s18 }
 0x19f   : > { %1571 = vrot.lane.b32.xlu1 %v3086_v8, %s2532_s13 }
 0x1a3   : > { %1462 = vrot.lane.b32.xlu1 %v3086_v8, %s2535_s30 }
 0x1a5   : > { %v2375_v10 = vpop.f32.mrf.mxu0 }
 0x1a6   : > { %v1177_v11 = vadd.f32 %v2375_v10, %v3013_v35 }
 0x1a7   : > { %v1168_v12 = vpop.f32.mrf.mxu0 }
 0x1a8   : > { %v1382_v3 = vsel %vm1260_vm14, %v1177_v11, 0.0  ;;  %v1169_v13 = vadd.f32 %v3013_v35, %v1168_v12  ;;  %v2500_v11 = vld [vmem:[%s3337_s4 + $0x80] sm:$0xff]  }
 0x1a9   : > { %v3097_v14 = vpack.c.bf16 %v2537_v42, %v1382_v3  ;;  %v2376_v17 = vpop.f32.mrf.mxu0  ;;  %2387 = vmatprep.subr.bf16.mxu0 %v2500_v11  ;;  %v793_v3 = vshrl.u32 %v2910_v9, 16 }
 0x1aa   : > { %v1380_v20 = vsel %vm1260_vm14, %v1169_v13, 0.0  ;;  %v797_v13 = vrot.slane %v795_v5, 1  ;;  %v800_v17 = vshll.u32 %v2482_v53, 16  ;;  %2388 = vmatpush3.bf16.msra.mxu0 %v2500_v11 }
 0x1ab   : > { %v3102_v33 = vpack.c.bf16 %v2537_v42, %v1380_v20  ;;  %1515 = vrot.lane.b32.xlu1 %v3097_v14, %s2532_s13  ;;  %1554 = vrot.lane.b32.xlu0 %v3097_v14, %s2536_s18  ;;  %v1171_v24 = vpop.f32.mrf.mxu0  ;;  %v3109_v25 = vrot.slane %v3097_v14, 1  ;;  %v1440_v31 = vshll.u32 %v3097_v14, 16  ;;  %v1438_v27 = vshrl.u32 %v3097_v14, 16 }
 0x1ac   : > { %v798_v24 = vor.u32 %v797_v13, %v793_v3 }
 0x1ad   : > { %v3112_v29 = vrot.slane %v3102_v33, 1  ;;  %v1433_v6 = vshll.u32 %v3102_v33, 16  ;;  %v1442_v34 = vrot.slane %v1440_v31, 1  ;;  %v1431_v36 = vshrl.u32 %v3102_v33, 16 }
 0x1ae   : > { %v802_v31 = vrot.slane %v800_v17, 1 }
 0x1af   : > { %1513 = vrot.lane.b32.xlu0 %v3102_v33, %s2532_s13  ;;  %1552 = vrot.lane.b32.xlu1 %v3102_v33, %s2536_s18  ;;  %v2231_v30 = vcombine.low %v3112_v29, %v3109_v25  ;;  %v1435_v18 = vrot.slane %v1433_v6, 1  ;;  %v3132_v37 = vor.u32 %v1442_v34, %v1438_v27  ;;  %v824_v34 = vrot.slane %v2910_v9, 1  ;;  %v3219_v9 = vpop.permute.xlu1 %787 }
 0x1b0   : > { %v803_v6 = vsel %vm489_vm2, %v798_v24, %v802_v31 }
 0x1b1   : > { %v3134_v38 = vor.u32 %v1435_v18, %v1431_v36  ;;  %v825_v18 = vrot.slane %v2482_v53, 1  ;;  %v3221_v36 = vpop.permute.xlu0 %820  ;;  %v1640_v53 = vsel %vm1588_vm12, %v2810_v19, %v2946_v44 }
 0x1b3   : > { %1500 = vrot.lane.b32.xlu0 %v3109_v25, %s2536_s18  ;;  %1539 = vrot.lane.b32.xlu1 %v3109_v25, %s2535_s30  ;;  %v826_v27 = vsel %vm630_vm1, %v824_v34, %v825_v18 }
 0x1b7   : > { %1498 = vrot.lane.b32.xlu1 %v3112_v29, %s2536_s18  ;;  %1537 = vrot.lane.b32.xlu0 %v3112_v29, %s2535_s30 }
 0x1bb   : > { %1577 = vrot.lane.b32.xlu0 %v3132_v37, %s2532_s13  ;;  %1575 = vrot.lane.b32.xlu1 %v3134_v38, %s2532_s13 }
 0x1bf   : > { %1468 = vrot.lane.b32.xlu0 %v3132_v37, %s2535_s30  ;;  %1466 = vrot.lane.b32.xlu1 %v3134_v38, %s2535_s30 }
 0x1c2   : > { %v2379_v40 = vpop.f32.mrf.mxu0 }
 0x1c3   : > { %v1193_v41 = vadd.f32 %v2379_v40, %v3013_v35 }
 0x1c4   : > { %v1184_v49 = vpop.f32.mrf.mxu0 }
 0x1c5   : > { %v1386_v50 = vsel %vm1260_vm14, %v1193_v41, 0.0  ;;  %v1185_v51 = vadd.f32 %v3013_v35, %v1184_v49 }
 0x1c6   : > { %v3157_v52 = vpack.c.bf16 %v2537_v42, %v1386_v50  ;;  %v2380_v1 = vpop.f32.mrf.mxu0 }
 0x1c7   : > { %v1384_v56 = vsel %vm1260_vm14, %v1185_v51, 0.0  ;;  %v2446_v1 = vunpack.i.h.bf16 %v2950_v46 }
 0x1c8   : > { %v3162_v58 = vpack.c.bf16 %v2537_v42, %v1384_v56  ;;  %1558 = vrot.lane.b32.xlu0 %v3157_v52, %s2536_s18  ;;  %v1187_v59 = vpop.f32.mrf.mxu0  ;;  %v1454_v61 = vshll.u32 %v3157_v52, 16  ;;  %v3170_v35 = vrot.slane %v3157_v52, 1  ;;  %v1452_v63 = vshrl.u32 %v3157_v52, 16 }
 0x1ca   : > { %1556 = vrot.lane.b32.xlu1 %v3162_v58, %s2536_s18  ;;  %v3173_v62 = vrot.slane %v3162_v58, 1  ;;  %v1456_v32 = vrot.slane %v1454_v61, 1  ;;  %v1447_v42 = vshll.u32 %v3162_v58, 16  ;;  %v1445_v12 = vshrl.u32 %v3162_v58, 16 }
 0x1cc   : > { %1517 = vrot.lane.b32.xlu0 %v3162_v58, %s2532_s13  ;;  %v2234_v43 = vcombine.low %v3173_v62, %v3170_v35  ;;  %v3187_v7 = vor.u32 %v1456_v32, %v1452_v63  ;;  %v1449_v10 = vrot.slane %v1447_v42, 1 }
 0x1ce   : > { %1504 = vrot.lane.b32.xlu1 %v3170_v35, %s2536_s18  ;;  %v3198_v20 = vor.u32 %v1449_v10, %v1445_v12 }
 0x1d0   : > { %1543 = vrot.lane.b32.xlu0 %v3170_v35, %s2535_s30 }
 0x1d2   : > { %1472 = vrot.lane.b32.xlu1 %v3187_v7, %s2535_s30 }
 0x1d4   : > { %1541 = vrot.lane.b32.xlu0 %v3173_v62, %s2535_s30 }
 0x1d6   : > { %1579 = vrot.lane.b32.xlu1 %v3198_v20, %s2532_s13 }
 0x1d8   : > { %1502 = vrot.lane.b32.xlu0 %v3173_v62, %s2536_s18 }
 0x1da   : > { %1519 = vrot.lane.b32.xlu1 %v3157_v52, %s2532_s13 }
 0x1dc   : > { %1581 = vrot.lane.b32.xlu0 %v3187_v7, %s2532_s13 }
 0x1de   : > { %822 = vrot.lane.b32.xlu1 %v803_v6, %s2531_s29 }
 0x1e0   : > { %1521 = vrot.lane.b32.xlu0 %v2533_v15, %s2532_s13  ;;  %v2445_v15 = vunpack.i.l.bf16 %v2950_v46 }
 0x1e2   : > { %845 = vrot.lane.b32.xlu1 %v826_v27, %s2532_s13  ;;  %v1590_v32 = vsel %vm1588_vm12, 0.0|0.0, %v2445_v15 }
 0x1e3   : > { %v1607_v5 = vsel %vm1605_vm13, %v1590_v32, %v2948_v45 }
 0x1e4   : > { %1470 = vrot.lane.b32.xlu0 %v3198_v20, %s2535_s30  ;;  %v1623_v24 = vsel %vm994_vm10, %v1607_v5, %v2952_v48 }
 0x1e8   : > { %843 = vrot.lane.b32.xlu0 %v2919_v23, %s2532_s13  ;;  %v1592_v23 = vsel %vm1588_vm12, 0.0|0.0, %v2446_v1  ;;  %s2264_s13 = sshll.u32 %s3345_s21, 5 }
 0x1e9   : > { %v1609_v46 = vsel %vm1605_vm13, %v1592_v23, %v2954_v47  ;;  %s370_s26 = scalar_lea.vmem %s3339_s6, %s2264_s13 }
 0x1fd   : > { %v1512_v40 = vpop.permute.xlu1 %1511  ;;  %v1551_v41 = vpop.permute.xlu0 %1550 }
 0x201   : > { %v1549_v49 = vpop.permute.xlu1 %1548  ;;  %v1510_v50 = vpop.permute.xlu0 %1509 }
 0x202   : > { %v1663_v10 = vsel %vm1605_vm13, %v1640_v53, %v1549_v49 }
 0x205   : > { %v1536_v51 = vpop.permute.xlu1 %1535  ;;  %v1497_v59 = vpop.permute.xlu0 %1496 }
 0x209   : > { %v1534_v56 = vpop.permute.xlu1 %1533  ;;  %v1574_v12 = vpop.permute.xlu0 %1573 }
 0x20a   : > { %v1643_v61 = vsel %vm1588_vm12, %v3086_v8, %v1534_v56  ;;  %v1625_v8 = vsel %vm994_vm10, %v1609_v46, %v1510_v50 }
 0x20b   : > { %v1665_v63 = vsel %vm1605_vm13, %v1643_v61, %v1551_v41  ;;  %v2226_v44 = vcombine.low %v1623_v24, %v1625_v8 }
 0x20c   : > { %v1681_v17 = vsel %vm994_vm10, %v1665_v63, %v1574_v12 }
 0x20d   : > { %v1495_v42 = vpop.permute.xlu1 %1494  ;;  %v1465_v45 = vpop.permute.xlu0 %1464 }
 0x20e   : > { %v1596_v49 = vsel %vm1588_vm12, %v3027_v22, %v1465_v45 }
 0x20f   : > { %v1613_v56 = vsel %vm1605_vm13, %v1596_v49, %v1497_v59 }
 0x211   : > { %v1572_v3 = vpop.permute.xlu1 %1571 }
 0x212   : > { %v1679_v13 = vsel %vm994_vm10, %v1663_v10, %v1572_v3  ;;  %v2450_v3 = vunpack.i.l.bf16 %v2990_v28 }
 0x213   : > { %v2227_v19 = vcombine.low %v1679_v13, %v1681_v17 }
 0x215   : > { %1949 = vmatprep.mubr.bf16.mxu1 %v2227_v19  ;;  %v1463_v47 = vpop.permute.xlu1 %1462 }
 0x216   : > { %1950 = vmatmul.mubr.bf16.vlgmr.msra.gmra.mxu1 %v2226_v44  ;;  %v1594_v48 = vsel %vm1588_vm12, %v3038_v54, %v1463_v47 }
 0x217   : > { %2399 = vmatpush3.bf16.msra.mxu1 %v3139_v39  ;;  %v1611_v15 = vsel %vm1605_vm13, %v1594_v48, %v1495_v42 }
 0x218   : > { %2398 = vmatprep.subr.bf16.mxu1 %v2500_v11 }
 0x21b   : > { %2400 = vmatpush3.bf16.msra.mxu1 %v2500_v11  ;;  %v1646_v11 = vsel %vm1588_vm12, %v3074_v0, %v1536_v51 }
 0x21d   : > { %v1516_v31 = vpop.permute.xlu1 %1515  ;;  %v1555_v6 = vpop.permute.xlu0 %1554 }
 0x221   : > { %v1553_v34 = vpop.permute.xlu1 %1552  ;;  %v1514_v18 = vpop.permute.xlu0 %1513 }
 0x222   : > { %v1667_v61 = vsel %vm1605_vm13, %v1646_v11, %v1553_v34  ;;  %v1629_v23 = vsel %vm994_vm10, %v1613_v56, %v1514_v18 }
 0x225   : > { %v1540_v27 = vpop.permute.xlu1 %1539  ;;  %v1501_v41 = vpop.permute.xlu0 %1500 }
 0x229   : > { %v1499_v50 = vpop.permute.xlu1 %1498  ;;  %v1538_v1 = vpop.permute.xlu0 %1537 }
 0x22a   : > { %v1649_v39 = vsel %vm1588_vm12, %v3134_v38, %v1538_v1  ;;  %v1627_v38 = vsel %vm994_vm10, %v1611_v15, %v1512_v40 }
 0x22b   : > { %v1669_v32 = vsel %vm1605_vm13, %v1649_v39, %v1555_v6  ;;  %v2229_v0 = vcombine.low %v1627_v38, %v1629_v23 }
 0x22d   : > { %v1576_v22 = vpop.permute.xlu1 %1575  ;;  %v1578_v54 = vpop.permute.xlu0 %1577 }
 0x22e   : > { %v1683_v63 = vsel %vm994_vm10, %v1667_v61, %v1576_v22  ;;  %v1685_v53 = vsel %vm994_vm10, %v1669_v32, %v1578_v54  ;;  %v991_v54 = vsel %vm973_vm9, %v2988_v26, %v3221_v36 }
 0x22f   : > { %v2230_v5 = vcombine.low %v1683_v63, %v1685_v53 }
 0x231   : > { %1957 = vmatprep.mubr.bf16.mxu1 %v2230_v5  ;;  %v1469_v51 = vpop.permute.xlu0 %1468  ;;  %v1467_v59 = vpop.permute.xlu1 %1466 }
 0x232   : > { %1958 = vmatmul.mubr.bf16.gmra.mxu1 %v2229_v0  ;;  %v1598_v47 = vsel %vm1588_vm12, %v3102_v33, %v1467_v59  ;;  %v1600_v6 = vsel %vm1588_vm12, %v3097_v14, %v1469_v51 }
 0x233   : > { %v1615_v34 = vsel %vm1605_vm13, %v1598_v47, %v1499_v50  ;;  %v1617_v18 = vsel %vm1605_vm13, %v1600_v6, %v1501_v41  ;;  %v2225_v6 = vld [vmem:[%s3338_s5] ss:$0 sm:$0xff] }
 0x23a   : > { %v1559_v42 = vpop.permute.xlu0 %1558 }
 0x23c   : > { %v1557_v46 = vpop.permute.xlu1 %1556 }
 0x23e   : > { %v1518_v10 = vpop.permute.xlu0 %1517 }
 0x23f   : > { %v1633_v48 = vsel %vm994_vm10, %v1617_v18, %v1518_v10 }
 0x240   : > { %v1505_v8 = vpop.permute.xlu1 %1504 }
 0x242   : > { %v1544_v12 = vpop.permute.xlu0 %1543 }
 0x243   : > { %v1658_v13 = vsel %vm1588_vm12, %v3187_v7, %v1544_v12 }
 0x244   : > { %v1675_v17 = vsel %vm1605_vm13, %v1658_v13, %v2966_v2  ;;  %v1473_v40 = vpop.permute.xlu1 %1472  ;;  %v1652_v2 = vsel %vm1588_vm12, %v3132_v37, %v1540_v27 }
 0x245   : > { %v1691_v24 = vsel %vm994_vm10, %v1675_v17, %v2450_v3  ;;  %v1604_v41 = vsel %vm1588_vm12, %v3157_v52, %v1473_v40  ;;  %v972_v52 = vsel %vm952_vm8, %v2981_v21, %v3219_v9  ;;  %v2237_v21 = vcombine.low %v2808_v16, %v2808_v16 }
 0x246   : > { %v1542_v19 = vpop.permute.xlu0 %1541  ;;  %v2236_v44 = vcombine.low %v1691_v24, %v3000_v4  ;;  %v1671_v4 = vsel %vm1605_vm13, %v1652_v2, %v1557_v46  ;;  %v1621_v61 = vsel %vm1605_vm13, %v1604_v41, %v1505_v8 }
 0x247   : > { %v1655_v7 = vsel %vm1588_vm12, %v3198_v20, %v1542_v19  ;;  %v1631_v20 = vsel %vm994_vm10, %v1615_v34, %v1516_v31 }
 0x248   : > { %v1580_v45 = vpop.permute.xlu1 %1579  ;;  %v1673_v33 = vsel %vm1605_vm13, %v1655_v7, %v1559_v42  ;;  %v2232_v37 = vcombine.low %v1631_v20, %v1633_v48 }
 0x249   : > { %v1687_v14 = vsel %vm994_vm10, %v1671_v4, %v1580_v45 }
 0x24a   : > { %v1503_v28 = vpop.permute.xlu0 %1502 }
 0x24c   : > { %v1520_v49 = vpop.permute.xlu1 %1519 }
 0x24e   : > { %v1582_v1 = vpop.permute.xlu0 %1581 }
 0x24f   : > { %v1689_v39 = vsel %vm994_vm10, %v1673_v33, %v1582_v1 }
 0x250   : > { %v2233_v11 = vcombine.low %v1687_v14, %v1689_v39  ;;  %v823_v50 = vpop.permute.xlu1 %822 }
 0x252   : > { %v1522_v27 = vpop.permute.xlu0 %1521  ;;  %1965 = vmatprep.mubr.bf16.mxu1 %v2233_v11 }
 0x253   : > { %1966 = vmatmul.mubr.bf16.gmra.mxu1 %v2232_v37  ;;  %v1637_v31 = vsel %vm994_vm10, %v1621_v61, %v1522_v27 }
 0x254   : > { %1973 = vmatprep.mubr.bf16.mxu1 %v2236_v44  ;;  %v846_v22 = vpop.permute.xlu1 %845 }
 0x256   : > { %v1471_v15 = vpop.permute.xlu0 %1470 }
 0x257   : > { %v1602_v56 = vsel %vm1588_vm12, %v3162_v58, %v1471_v15  ;;  %v993_v58 = vsel %vm973_vm9, %v972_v52, %v823_v50 }
 0x258   : > { %v1619_v23 = vsel %vm1605_vm13, %v1602_v56, %v1503_v28  ;;  %v1014_v5 = vsel %vm994_vm10, %v993_v58, %v846_v22 }
 0x259   : > { %v1635_v32 = vsel %vm994_vm10, %v1619_v23, %v1520_v49 }
 0x25a   : > { %v844_v63 = vpop.permute.xlu0 %843  ;;  %v2235_v53 = vcombine.low %v1635_v32, %v1637_v31 }
 0x25b   : > { %v1012_v38 = vsel %vm994_vm10, %v991_v54, %v844_v63 }
 0x25c   : > { %2381 = vmatprep.mubr.msk.bf16.mxu0 %vm1077_vm11, %v1012_v38  ;;  %1974 = vmatmul.mubr.bf16.gmra.mxu1 %v2235_v53 }
 0x25d   : > { %2382 = vmatmul.mubr.msk.bf16.gmra.mxu0 %vm1077_vm11, %v1014_v5  ;;  %2393 = vmatprep.mubr.msk.bf16.mxu1 %vm1588_vm12, %v2234_v43 }
 0x25e   : > { %2389 = vmatprep.mubr.msk.bf16.mxu0 %vm1588_vm12, %v2228_v60 }
 0x264   : > { %2394 = vmatmul.mubr.msk.bf16.vlgmr.msra.gmra.mxu1 %vm1588_vm12, %v2237_v21 }
 0x265   : > { %2390 = vmatmul.mubr.msk.bf16.vlgmr.msra.gmra.mxu0 %vm1588_vm12, %v2231_v30 }
 0x2d6   : > { %v2321_v26 = vpop.f32.mrf.mxu1 }
 0x2d8   : > { %v2322_v9 = vpop.f32.mrf.mxu1 }
 0x2d9   : > { %v2323_v45 = vadd.f32 %v2322_v9, %v2321_v26 }
 0x2da   : > { %v2324_v35 = vpop.f32.mrf.mxu1 }
 0x2db   : > { %v1952_v11 = vadd.f32 %v2323_v45, %v2225_v6 }
 0x2dc   : > { %v2325_v62 = vpop.f32.mrf.mxu1 }
 0x2dd   : > { %v2326_v47 = vadd.f32 %v2325_v62, %v2324_v35 }
 0x2df   : > { %v1955_v50 = vadd.f32 %v2326_v47, %v2225_v6 }
 0x2f2   : > { %v2327_v43 = vpop.f32.mrf.mxu1 }
 0x2f4   : > { %v2328_v36 = vpop.f32.mrf.mxu1 }
 0x2f5   : > { %v2329_v13 = vadd.f32 %v2328_v36, %v2327_v43 }
 0x2f6   : > { %v2330_v0 = vpop.f32.mrf.mxu1 }
 0x2f7   : > { %v1960_v18 = vadd.f32 %v2329_v13, %v2225_v6 }
 0x2f8   : > { %v2331_v55 = vpop.f32.mrf.mxu1 }
 0x2f9   : > { %v2332_v17 = vadd.f32 %v2331_v55, %v2330_v0 }
 0x2fb   : > { %v1963_v4 = vadd.f32 %v2332_v17, %v2225_v6 }
 0x313   : > { %v2333_v57 = vpop.f32.mrf.mxu1 }
 0x315   : > { %v2334_v60 = vpop.f32.mrf.mxu1 }
 0x316   : > { %v2335_v24 = vadd.f32 %v2334_v60, %v2333_v57 }
 0x317   : > { %v2336_v51 = vpop.f32.mrf.mxu1 }
 0x318   : > { %v1968_v33 = vadd.f32 %v2335_v24, %v2225_v6 }
 0x319   : > { %v2337_v59 = vpop.f32.mrf.mxu1 }
 0x31a   : > { %v2338_v19 = vadd.f32 %v2337_v59, %v2336_v51 }
 0x31c   : > { %v2339_v16 = vpop.f32.mrf.mxu1  ;;  %v1971_v39 = vadd.f32 %v2338_v19, %v2225_v6 }
 0x31d   : > { %v2383_v42 = vpop.f32.mrf.mxu0 }
 0x31e   : > { %v2340_v46 = vpop.f32.mrf.mxu1 }
 0x31f   : > { %v1200_v10 = vpop.f32.mrf.mxu0  ;;  %v2341_v30 = vadd.f32 %v2340_v46, %v2339_v16 }
 0x320   : > { %v2342_v8 = vpop.f32.mrf.mxu1 }
 0x321   : > { %v2384_v25 = vpop.f32.mrf.mxu0  ;;  %v1976_v7 = vadd.f32 %v2341_v30, %v2225_v6 }
 0x322   : > { %v2343_v29 = vpop.f32.mrf.mxu1 }
 0x323   : > { %v2344_v12 = vadd.f32 %v2343_v29, %v2342_v8  ;;  %v1203_v3 = vpop.f32.mrf.mxu0 }
 0x324   : > { %v2395_v40 = vpop.f32.mrf.mxu1 }
 0x325   : > { %v2391_v44 = vpop.f32.mrf.mxu0  ;;  %v1979_v34 = vadd.f32 %v2344_v12, %v2225_v6  ;;  %v2041_v48 = vadd.f32 %v2395_v40, %v1976_v7 }
 0x326   : > { %v2032_v28 = vpop.f32.mrf.mxu1  ;;  %v2025_v20 = vadd.f32 %v2391_v44, %v1960_v18 }
 0x327   : > { %v2016_v2 = vpop.f32.mrf.mxu0  ;;  %v2033_v41 = vadd.f32 %v2032_v28, %v1968_v33 }
 0x328   : > { %v2396_v49 = vpop.f32.mrf.mxu1  ;;  %v2017_v23 = vadd.f32 %v2016_v2, %v1952_v11 }
 0x329   : > { %v2044_v1 = vadd.f32 %v2396_v49, %v1979_v34  ;;  %v2392_v14 = vpop.f32.mrf.mxu0 }
 0x32a   : > { %v2028_v37 = vadd.f32 %v2392_v14, %v1963_v4  ;;  %v2035_v27 = vpop.f32.mrf.mxu1 }
 0x32b   : > { %v2283_v15 = vpack.c.bf16 %v2044_v1, %v2041_v48  ;;  %v2036_v56 = vadd.f32 %v2035_v27, %v1971_v39  ;;  %v2019_v61 = vpop.f32.mrf.mxu0 }
 0x32c   : > { %v2273_v31 = vpack.c.bf16 %v2028_v37, %v2025_v20  ;;  %v2020_v22 = vadd.f32 %v2019_v61, %v1955_v50 }
 0x32d   : > { %2287 = vst [vmem:[%s370_s26 + $0x18] sm:$0xff] %v2283_v15   ;;  %v2278_v32 = vpack.c.bf16 %v2036_v56, %v2033_v41 }
 0x32e   : > { %2285 = vst [vmem:[%s370_s26 + $0x8] sm:$0xff] %v2273_v31   ;;  %v2268_v54 = vpack.c.bf16 %v2020_v22, %v2017_v23 }
 0x32f   : > { %2286 = vst [vmem:[%s370_s26 + $0x10] sm:$0xff] %v2278_v32  }
 0x330   : > { %2269 = vst [vmem:[%s370_s26] sm:$0xff] %v2268_v54  }
 0x331 PF: > { %s16_s23 = sadd.s32 1, %s2523_s23   ;;  %s3340_s21 = smov %s2519_s22 }
 0x332   : > { %p13_p5 = scmp.ge.s32.totalorder %s16_s23, 4   ;;  %s3341_s22 = smov %s3343_s24 }
 0x334   :  { %15 = sbr.rel (!%p13_p5) target bundleno = 2 (0x2), region = 77 }

</bundles_post_ra>
